<compile_context>
chip_gen: v5e
topology: v5e:2x2
jax: 0.10.0
libtpu: 0.0.40
codegen_flags: <defaults>
</compile_context>

<pallas_src>
import jax
import jax.numpy as jnp
from jax import lax
from jax.experimental import pallas as pl
from jax.experimental.pallas import tpu as pltpu

EMB_DIM = 64
HIDDEN_LAYERS = [64, 32, 16, 8]
TB_MAX = 1024          # batch tile (rows per grid step)


def _round_up(x, m):
    return (x + m - 1) // m * m


def ncf_fused_kernel(u_ref, it_ref, s_ref, g_ref,                 # (TB,1) int32 indices
                     ut_ref, itab_ref, st_ref, gt_ref,            # bf16 tables (Vp, D)
                     w0u_ref, w0i_ref, w0s_ref, w0g_ref, b0_ref,  # layer-0 slices + f32 bias
                     w1_ref, b1_ref, w2_ref, b2_ref, w3_ref, b3_ref,
                     wo_t_ref, bo_ref,                            # output head (1,H3), (1,1)
                     out_ref):                                    # (1, 1, TB) f32
    tb = u_ref.shape[0]

    def gather_then_l0(idx_ref, tab_ref, w_ref):
        # Embedding row-gather as a one-hot matmul (MXU), fused with the matching
        # slice of the first Linear layer.
        v = tab_ref.shape[0]
        idx = idx_ref[...]                                          # (TB, 1) int32
        onehot = jnp.where(
            idx == lax.broadcasted_iota(jnp.int32, (tb, v), 1),
            1.0, 0.0).astype(jnp.bfloat16)                          # (TB, V)
        emb = jnp.dot(onehot, tab_ref[...],
                      preferred_element_type=jnp.float32)           # exact bf16 rows
        return jnp.dot(emb.astype(jnp.bfloat16), w_ref[...],
                       preferred_element_type=jnp.float32)          # (TB, H0) f32

    h = (gather_then_l0(u_ref, ut_ref, w0u_ref)
         + gather_then_l0(it_ref, itab_ref, w0i_ref)
         + gather_then_l0(s_ref, st_ref, w0s_ref)
         + gather_then_l0(g_ref, gt_ref, w0g_ref))
    h = jnp.maximum(h + b0_ref[...], 0.0)                           # f32 bias + ReLU

    for w_ref, b_ref in ((w1_ref, b1_ref), (w2_ref, b2_ref), (w3_ref, b3_ref)):
        h = jnp.dot(h.astype(jnp.bfloat16), w_ref[...],
                    preferred_element_type=jnp.float32) + b_ref[...]
        h = jnp.maximum(h, 0.0)

    # Output Linear(H3 -> 1), lane-dense: (1,H3) contracted with (TB,H3) -> (1, TB)
    pred = lax.dot_general(wo_t_ref[...], h.astype(jnp.bfloat16),
                           dimension_numbers=(((1,), (1,)), ((), ())),
                           preferred_element_type=jnp.float32)
    out_ref[...] = (pred + bo_ref[...]).reshape(out_ref.shape)


def _pad_table(tab, mult=128):
    """Zero-pad table rows to a lane/sublane-aligned count (indices never hit pad rows)."""
    v = tab.shape[0]
    vp = _round_up(v, mult)
    return tab if vp == v else jnp.pad(tab, ((0, vp - v), (0, 0)))


def ncf_forward(params, user_indices, item_indices,
                social_indices=None, giver_indices=None):
    """Matches NCF.forward with use_time=False. Returns shape (B,) float32."""
    nu = params["user"].shape[0]        # num_users + 1
    ni = params["item"].shape[0]        # num_items + 1
    d = params["user"].shape[1]

    if social_indices is None:
        social_indices = user_indices
    if giver_indices is None:
        giver_indices = user_indices

    u = jnp.clip(user_indices, 0, nu - 1).astype(jnp.int32)
    it = jnp.clip(item_indices, 0, ni - 1).astype(jnp.int32)
    s = jnp.clip(social_indices, 0, nu - 1).astype(jnp.int32)
    g = jnp.clip(giver_indices, 0, nu - 1).astype(jnp.int32)

    b = u.shape[0]
    tb = min(TB_MAX, _round_up(max(b, 1), 128))
    b_pad = _round_up(b, tb)
    grid_n = b_pad // tb

    def prep_idx(idx):
        return jnp.pad(idx, (0, b_pad - b)).reshape(b_pad, 1)

    idx_blocks = [prep_idx(x) for x in (u, it, s, g)]

    # MXU operands in bf16 (tables / weights); biases stay f32.
    tabs = [_pad_table(params[k].astype(jnp.bfloat16))
            for k in ("user", "item", "social", "giver")]
    w0, b0 = params["mlp"][0]
    w0_bf = w0.astype(jnp.bfloat16)
    w0_slices = [w0_bf[k * d:(k + 1) * d, :] for k in range(4)]
    layer_args = []
    for w, bias in params["mlp"][1:]:
        layer_args += [w.astype(jnp.bfloat16), bias.astype(jnp.float32)]
    wo_t = params["out_w"].astype(jnp.bfloat16).T            # (1, H3)
    bo = params["out_b"].astype(jnp.float32)                 # (1, 1)

    flat_in = (idx_blocks + tabs + w0_slices + [b0.astype(jnp.float32)]
               + layer_args + [wo_t, bo])

    idx_spec = pl.BlockSpec((tb, 1), lambda i: (i, 0))                 # pipelined per tile
    resident = lambda arr: pl.BlockSpec(arr.shape, lambda i: (0, 0))   # DMA'd once, stays in VMEM
    in_specs = [idx_spec] * 4 + [resident(x) for x in flat_in[4:]]
    out_specs = pl.BlockSpec((1, 1, tb), lambda i: (i, 0, 0))          # lane-dense output row

    out = pl.pallas_call(
        ncf_fused_kernel,
        out_shape=jax.ShapeDtypeStruct((grid_n, 1, tb), jnp.float32),
        grid_spec=pltpu.PrefetchScalarGridSpec(
            num_scalar_prefetch=0,
            grid=(grid_n,),
            in_specs=in_specs,
            out_specs=out_specs,
        ),
        compiler_params=pltpu.CompilerParams(
            dimension_semantics=("parallel",),   # shard batch tiles across TCs on v7x
        ),
    )(*flat_in)

    # TODO(synk): use_time=True branch (time_linear) not implemented; module default is use_time=False.
    return out.reshape(-1)[:b]


def init_params(key, num_users, num_items, embedding_dim=EMB_DIM,
                hidden_layers=HIDDEN_LAYERS):
    """Deterministic synthetic parameters (mirrors the module's shapes), all f32."""
    keys = jax.random.split(key, 16)
    ki = iter(range(16))

    def emb(k, rows):
        return jax.random.normal(k, (rows, embedding_dim), jnp.float32) * 0.05

    params = {}
    # Embedding tables with padding row zeroed (like nn.Embedding padding_idx=num_users).
    user_tab = emb(keys[next(ki)], num_users + 1).at[num_users].set(0.0)
    item_tab = emb(keys[next(ki)], num_items + 1)
    # NOTE: the module uses padding_idx=num_users for the ITEM table too (a quirk of the
    # original code); only valid/applied when num_users <= num_items. Intentional.
    if num_users <= num_items:
        item_tab = item_tab.at[num_users].set(0.0)
    social_tab = emb(keys[next(ki)], num_users + 1).at[num_users].set(0.0)
    giver_tab = emb(keys[next(ki)], num_users + 1).at[num_users].set(0.0)
    params["user"] = user_tab
    params["item"] = item_tab
    params["social"] = social_tab
    params["giver"] = giver_tab

    # MLP: Linear(in, h) + ReLU chain (weights stored (in, out) so x @ W + b).
    in_size = embedding_dim * 4  # use_time=False
    mlp = []
    for h in hidden_layers:
        w = jax.random.normal(keys[next(ki)], (in_size, h), jnp.float32) * (1.0 / jnp.sqrt(in_size))
        b = jax.random.normal(keys[next(ki)], (1, h), jnp.float32) * 0.01
        mlp.append((w, b))
        in_size = h
    params["mlp"] = mlp

    params["out_w"] = jax.random.normal(keys[next(ki)], (in_size, 1), jnp.float32) * (1.0 / jnp.sqrt(in_size))
    params["out_b"] = jax.random.normal(keys[next(ki)], (1, 1), jnp.float32) * 0.01
    return params


def ncf_reference(params, user_indices, item_indices):
    """Pure-JAX f32 reference (faithful to the PyTorch module) for correctness check."""
    nu = params["user"].shape[0]
    ni = params["item"].shape[0]
    u = jnp.clip(user_indices, 0, nu - 1)
    i = jnp.clip(item_indices, 0, ni - 1)
    vec = jnp.concatenate(
        [params["user"][u], params["item"][i],
         params["social"][u], params["giver"][u]], axis=-1)
    h = vec
    for w, b in params["mlp"]:
        h = jnp.maximum(h @ w + b, 0.0)
    return (h @ params["out_w"] + params["out_b"]).reshape(-1)


if __name__ == "__main__":
    num_users, num_items = 40, 60
    batch = 16

    key = jax.random.PRNGKey(0)
    pkey, ukey, ikey = jax.random.split(key, 3)
    params = init_params(pkey, num_users, num_items)

    user_indices = jax.random.randint(ukey, (batch,), 0, num_users + 1, dtype=jnp.int32)
    item_indices = jax.random.randint(ikey, (batch,), 0, num_items + 1, dtype=jnp.int32)

    fwd = jax.jit(ncf_forward)
    out = jax.block_until_ready(fwd(params, user_indices, item_indices))

    ref = ncf_reference(params, user_indices, item_indices)
    assert out.shape == (batch,)
    # Kernel uses bf16 MXU operands (f32 accumulation) vs an all-f32 reference:
    # tolerance loosened accordingly.
    assert jnp.allclose(out, ref, atol=2e-2, rtol=2e-2), (out, ref)

    print("KERNEL_OK")
</pallas_src>

<mosaic_0001>
module attributes {stable_mosaic.version = 11 : i64} {
  func.func @ncf_fused_kernel(%arg0: i32, %arg1: memref<128x1xi32, #tpu.memory_space<vmem>>, %arg2: memref<128x1xi32, #tpu.memory_space<vmem>>, %arg3: memref<128x1xi32, #tpu.memory_space<vmem>>, %arg4: memref<128x1xi32, #tpu.memory_space<vmem>>, %arg5: memref<128x64xbf16, #tpu.memory_space<vmem>>, %arg6: memref<128x64xbf16, #tpu.memory_space<vmem>>, %arg7: memref<128x64xbf16, #tpu.memory_space<vmem>>, %arg8: memref<128x64xbf16, #tpu.memory_space<vmem>>, %arg9: memref<64x64xbf16, #tpu.memory_space<vmem>>, %arg10: memref<64x64xbf16, #tpu.memory_space<vmem>>, %arg11: memref<64x64xbf16, #tpu.memory_space<vmem>>, %arg12: memref<64x64xbf16, #tpu.memory_space<vmem>>, %arg13: memref<1x64xf32, #tpu.memory_space<vmem>>, %arg14: memref<64x32xbf16, #tpu.memory_space<vmem>>, %arg15: memref<1x32xf32, #tpu.memory_space<vmem>>, %arg16: memref<32x16xbf16, #tpu.memory_space<vmem>>, %arg17: memref<1x16xf32, #tpu.memory_space<vmem>>, %arg18: memref<16x8xbf16, #tpu.memory_space<vmem>>, %arg19: memref<1x8xf32, #tpu.memory_space<vmem>>, %arg20: memref<1x8xbf16, #tpu.memory_space<vmem>>, %arg21: memref<1x1xf32, #tpu.memory_space<vmem>>, %arg22: memref<1x1x128xf32, #tpu.memory_space<vmem>>) attributes {dimension_semantics = [#tpu.dimension_semantics<parallel>], iteration_bounds = array<i64: 1>, scalar_prefetch = 0 : i64, scratch_operands = 0 : i64, tpu.core_type = #tpu.core_type<tc>, window_params = [{transform_indices = @transform_0, window_bounds = array<i64: 128, 1>}, {transform_indices = @transform_1, window_bounds = array<i64: 128, 1>}, {transform_indices = @transform_2, window_bounds = array<i64: 128, 1>}, {transform_indices = @transform_3, window_bounds = array<i64: 128, 1>}, {pipeline_mode = #tpu.pipeline_mode<synchronous>, transform_indices = @transform_4, window_bounds = array<i64: 128, 64>}, {pipeline_mode = #tpu.pipeline_mode<synchronous>, transform_indices = @transform_5, window_bounds = array<i64: 128, 64>}, {pipeline_mode = #tpu.pipeline_mode<synchronous>, transform_indices = @transform_6, window_bounds = array<i64: 128, 64>}, {pipeline_mode = #tpu.pipeline_mode<synchronous>, transform_indices = @transform_7, window_bounds = array<i64: 128, 64>}, {pipeline_mode = #tpu.pipeline_mode<synchronous>, transform_indices = @transform_8, window_bounds = array<i64: 64, 64>}, {pipeline_mode = #tpu.pipeline_mode<synchronous>, transform_indices = @transform_9, window_bounds = array<i64: 64, 64>}, {pipeline_mode = #tpu.pipeline_mode<synchronous>, transform_indices = @transform_10, window_bounds = array<i64: 64, 64>}, {pipeline_mode = #tpu.pipeline_mode<synchronous>, transform_indices = @transform_11, window_bounds = array<i64: 64, 64>}, {pipeline_mode = #tpu.pipeline_mode<synchronous>, transform_indices = @transform_12, window_bounds = array<i64: 1, 64>}, {pipeline_mode = #tpu.pipeline_mode<synchronous>, transform_indices = @transform_13, window_bounds = array<i64: 64, 32>}, {pipeline_mode = #tpu.pipeline_mode<synchronous>, transform_indices = @transform_14, window_bounds = array<i64: 1, 32>}, {pipeline_mode = #tpu.pipeline_mode<synchronous>, transform_indices = @transform_15, window_bounds = array<i64: 32, 16>}, {pipeline_mode = #tpu.pipeline_mode<synchronous>, transform_indices = @transform_16, window_bounds = array<i64: 1, 16>}, {pipeline_mode = #tpu.pipeline_mode<synchronous>, transform_indices = @transform_17, window_bounds = array<i64: 16, 8>}, {pipeline_mode = #tpu.pipeline_mode<synchronous>, transform_indices = @transform_18, window_bounds = array<i64: 1, 8>}, {pipeline_mode = #tpu.pipeline_mode<synchronous>, transform_indices = @transform_19, window_bounds = array<i64: 1, 8>}, {pipeline_mode = #tpu.pipeline_mode<synchronous>, transform_indices = @transform_20, window_bounds = array<i64: 1, 1>}, {transform_indices = @transform_21, window_bounds = array<i64: 1, 1, 128>}]} {
    %c0 = arith.constant 0 : index
    %c0_0 = arith.constant 0 : index
    %0 = vector.load %arg1[%c0, %c0_0] : memref<128x1xi32, #tpu.memory_space<vmem>>, vector<128x1xi32>
    %1 = tpu.iota {dimensions = array<i32: 1>} : vector<128x128xi32>
    %2 = vector.broadcast %0 : vector<128x1xi32> to vector<128x128xi32>
    %3 = arith.cmpi eq, %2, %1 : vector<128x128xi32>
    %cst = arith.constant 1.000000e+00 : f32
    %cst_1 = arith.constant 0.000000e+00 : f32
    %4 = vector.broadcast %cst : f32 to vector<128x128xf32>
    %5 = vector.broadcast %cst_1 : f32 to vector<128x128xf32>
    %6 = arith.select %3, %4, %5 : vector<128x128xi1>, vector<128x128xf32>
    %7 = arith.truncf %6 : vector<128x128xf32> to vector<128x128xbf16>
    %c0_2 = arith.constant 0 : index
    %c0_3 = arith.constant 0 : index
    %8 = vector.load %arg5[%c0_2, %c0_3] : memref<128x64xbf16, #tpu.memory_space<vmem>>, vector<128x64xbf16>
    %cst_4 = arith.constant dense<0.000000e+00> : vector<128x64xf32>
    %9 = tpu.matmul %7, %8, %cst_4 {dimension_numbers = #tpu.dot_dimension_numbers<[1], [0], [0], [1], [0, 0, 1, 1], [], []>} : vector<128x128xbf16>, vector<128x64xbf16>, vector<128x64xf32> -> vector<128x64xf32>
    %10 = arith.truncf %9 : vector<128x64xf32> to vector<128x64xbf16>
    %c0_5 = arith.constant 0 : index
    %c0_6 = arith.constant 0 : index
    %11 = vector.load %arg9[%c0_5, %c0_6] : memref<64x64xbf16, #tpu.memory_space<vmem>>, vector<64x64xbf16>
    %cst_7 = arith.constant dense<0.000000e+00> : vector<128x64xf32>
    %12 = tpu.matmul %10, %11, %cst_7 {dimension_numbers = #tpu.dot_dimension_numbers<[1], [0], [0], [1], [0, 0, 1, 1], [], []>} : vector<128x64xbf16>, vector<64x64xbf16>, vector<128x64xf32> -> vector<128x64xf32>
    %c0_8 = arith.constant 0 : index
    %c0_9 = arith.constant 0 : index
    %13 = vector.load %arg2[%c0_8, %c0_9] : memref<128x1xi32, #tpu.memory_space<vmem>>, vector<128x1xi32>
    %14 = tpu.iota {dimensions = array<i32: 1>} : vector<128x128xi32>
    %15 = vector.broadcast %13 : vector<128x1xi32> to vector<128x128xi32>
    %16 = arith.cmpi eq, %15, %14 : vector<128x128xi32>
    %cst_10 = arith.constant 1.000000e+00 : f32
    %cst_11 = arith.constant 0.000000e+00 : f32
    %17 = vector.broadcast %cst_10 : f32 to vector<128x128xf32>
    %18 = vector.broadcast %cst_11 : f32 to vector<128x128xf32>
    %19 = arith.select %16, %17, %18 : vector<128x128xi1>, vector<128x128xf32>
    %20 = arith.truncf %19 : vector<128x128xf32> to vector<128x128xbf16>
    %c0_12 = arith.constant 0 : index
    %c0_13 = arith.constant 0 : index
    %21 = vector.load %arg6[%c0_12, %c0_13] : memref<128x64xbf16, #tpu.memory_space<vmem>>, vector<128x64xbf16>
    %cst_14 = arith.constant dense<0.000000e+00> : vector<128x64xf32>
    %22 = tpu.matmul %20, %21, %cst_14 {dimension_numbers = #tpu.dot_dimension_numbers<[1], [0], [0], [1], [0, 0, 1, 1], [], []>} : vector<128x128xbf16>, vector<128x64xbf16>, vector<128x64xf32> -> vector<128x64xf32>
    %23 = arith.truncf %22 : vector<128x64xf32> to vector<128x64xbf16>
    %c0_15 = arith.constant 0 : index
    %c0_16 = arith.constant 0 : index
    %24 = vector.load %arg10[%c0_15, %c0_16] : memref<64x64xbf16, #tpu.memory_space<vmem>>, vector<64x64xbf16>
    %cst_17 = arith.constant dense<0.000000e+00> : vector<128x64xf32>
    %25 = tpu.matmul %23, %24, %cst_17 {dimension_numbers = #tpu.dot_dimension_numbers<[1], [0], [0], [1], [0, 0, 1, 1], [], []>} : vector<128x64xbf16>, vector<64x64xbf16>, vector<128x64xf32> -> vector<128x64xf32>
    %26 = arith.addf %12, %25 : vector<128x64xf32>
    %c0_18 = arith.constant 0 : index
    %c0_19 = arith.constant 0 : index
    %27 = vector.load %arg3[%c0_18, %c0_19] : memref<128x1xi32, #tpu.memory_space<vmem>>, vector<128x1xi32>
    %28 = tpu.iota {dimensions = array<i32: 1>} : vector<128x128xi32>
    %29 = vector.broadcast %27 : vector<128x1xi32> to vector<128x128xi32>
    %30 = arith.cmpi eq, %29, %28 : vector<128x128xi32>
    %cst_20 = arith.constant 1.000000e+00 : f32
    %cst_21 = arith.constant 0.000000e+00 : f32
    %31 = vector.broadcast %cst_20 : f32 to vector<128x128xf32>
    %32 = vector.broadcast %cst_21 : f32 to vector<128x128xf32>
    %33 = arith.select %30, %31, %32 : vector<128x128xi1>, vector<128x128xf32>
    %34 = arith.truncf %33 : vector<128x128xf32> to vector<128x128xbf16>
    %c0_22 = arith.constant 0 : index
    %c0_23 = arith.constant 0 : index
    %35 = vector.load %arg7[%c0_22, %c0_23] : memref<128x64xbf16, #tpu.memory_space<vmem>>, vector<128x64xbf16>
    %cst_24 = arith.constant dense<0.000000e+00> : vector<128x64xf32>
    %36 = tpu.matmul %34, %35, %cst_24 {dimension_numbers = #tpu.dot_dimension_numbers<[1], [0], [0], [1], [0, 0, 1, 1], [], []>} : vector<128x128xbf16>, vector<128x64xbf16>, vector<128x64xf32> -> vector<128x64xf32>
    %37 = arith.truncf %36 : vector<128x64xf32> to vector<128x64xbf16>
    %c0_25 = arith.constant 0 : index
    %c0_26 = arith.constant 0 : index
    %38 = vector.load %arg11[%c0_25, %c0_26] : memref<64x64xbf16, #tpu.memory_space<vmem>>, vector<64x64xbf16>
    %cst_27 = arith.constant dense<0.000000e+00> : vector<128x64xf32>
    %39 = tpu.matmul %37, %38, %cst_27 {dimension_numbers = #tpu.dot_dimension_numbers<[1], [0], [0], [1], [0, 0, 1, 1], [], []>} : vector<128x64xbf16>, vector<64x64xbf16>, vector<128x64xf32> -> vector<128x64xf32>
    %40 = arith.addf %26, %39 : vector<128x64xf32>
    %c0_28 = arith.constant 0 : index
    %c0_29 = arith.constant 0 : index
    %41 = vector.load %arg4[%c0_28, %c0_29] : memref<128x1xi32, #tpu.memory_space<vmem>>, vector<128x1xi32>
    %42 = tpu.iota {dimensions = array<i32: 1>} : vector<128x128xi32>
    %43 = vector.broadcast %41 : vector<128x1xi32> to vector<128x128xi32>
    %44 = arith.cmpi eq, %43, %42 : vector<128x128xi32>
    %cst_30 = arith.constant 1.000000e+00 : f32
    %cst_31 = arith.constant 0.000000e+00 : f32
    %45 = vector.broadcast %cst_30 : f32 to vector<128x128xf32>
    %46 = vector.broadcast %cst_31 : f32 to vector<128x128xf32>
    %47 = arith.select %44, %45, %46 : vector<128x128xi1>, vector<128x128xf32>
    %48 = arith.truncf %47 : vector<128x128xf32> to vector<128x128xbf16>
    %c0_32 = arith.constant 0 : index
    %c0_33 = arith.constant 0 : index
    %49 = vector.load %arg8[%c0_32, %c0_33] : memref<128x64xbf16, #tpu.memory_space<vmem>>, vector<128x64xbf16>
    %cst_34 = arith.constant dense<0.000000e+00> : vector<128x64xf32>
    %50 = tpu.matmul %48, %49, %cst_34 {dimension_numbers = #tpu.dot_dimension_numbers<[1], [0], [0], [1], [0, 0, 1, 1], [], []>} : vector<128x128xbf16>, vector<128x64xbf16>, vector<128x64xf32> -> vector<128x64xf32>
    %51 = arith.truncf %50 : vector<128x64xf32> to vector<128x64xbf16>
    %c0_35 = arith.constant 0 : index
    %c0_36 = arith.constant 0 : index
    %52 = vector.load %arg12[%c0_35, %c0_36] : memref<64x64xbf16, #tpu.memory_space<vmem>>, vector<64x64xbf16>
    %cst_37 = arith.constant dense<0.000000e+00> : vector<128x64xf32>
    %53 = tpu.matmul %51, %52, %cst_37 {dimension_numbers = #tpu.dot_dimension_numbers<[1], [0], [0], [1], [0, 0, 1, 1], [], []>} : vector<128x64xbf16>, vector<64x64xbf16>, vector<128x64xf32> -> vector<128x64xf32>
    %54 = arith.addf %40, %53 : vector<128x64xf32>
    %c0_38 = arith.constant 0 : index
    %c0_39 = arith.constant 0 : index
    %55 = vector.load %arg13[%c0_38, %c0_39] : memref<1x64xf32, #tpu.memory_space<vmem>>, vector<1x64xf32>
    %56 = vector.broadcast %55 : vector<1x64xf32> to vector<128x64xf32>
    %57 = arith.addf %54, %56 : vector<128x64xf32>
    %cst_40 = arith.constant 0.000000e+00 : f32
    %58 = vector.broadcast %cst_40 : f32 to vector<128x64xf32>
    %59 = arith.maximumf %57, %58 : vector<128x64xf32>
    %60 = arith.truncf %59 : vector<128x64xf32> to vector<128x64xbf16>
    %c0_41 = arith.constant 0 : index
    %c0_42 = arith.constant 0 : index
    %61 = vector.load %arg14[%c0_41, %c0_42] : memref<64x32xbf16, #tpu.memory_space<vmem>>, vector<64x32xbf16>
    %cst_43 = arith.constant dense<0.000000e+00> : vector<128x32xf32>
    %62 = tpu.matmul %60, %61, %cst_43 {dimension_numbers = #tpu.dot_dimension_numbers<[1], [0], [0], [1], [0, 0, 1, 1], [], []>} : vector<128x64xbf16>, vector<64x32xbf16>, vector<128x32xf32> -> vector<128x32xf32>
    %c0_44 = arith.constant 0 : index
    %c0_45 = arith.constant 0 : index
    %63 = vector.load %arg15[%c0_44, %c0_45] : memref<1x32xf32, #tpu.memory_space<vmem>>, vector<1x32xf32>
    %64 = vector.broadcast %63 : vector<1x32xf32> to vector<128x32xf32>
    %65 = arith.addf %62, %64 : vector<128x32xf32>
    %cst_46 = arith.constant 0.000000e+00 : f32
    %66 = vector.broadcast %cst_46 : f32 to vector<128x32xf32>
    %67 = arith.maximumf %65, %66 : vector<128x32xf32>
    %68 = arith.truncf %67 : vector<128x32xf32> to vector<128x32xbf16>
    %c0_47 = arith.constant 0 : index
    %c0_48 = arith.constant 0 : index
    %69 = vector.load %arg16[%c0_47, %c0_48] : memref<32x16xbf16, #tpu.memory_space<vmem>>, vector<32x16xbf16>
    %cst_49 = arith.constant dense<0.000000e+00> : vector<128x16xf32>
    %70 = tpu.matmul %68, %69, %cst_49 {dimension_numbers = #tpu.dot_dimension_numbers<[1], [0], [0], [1], [0, 0, 1, 1], [], []>} : vector<128x32xbf16>, vector<32x16xbf16>, vector<128x16xf32> -> vector<128x16xf32>
    %c0_50 = arith.constant 0 : index
    %c0_51 = arith.constant 0 : index
    %71 = vector.load %arg17[%c0_50, %c0_51] : memref<1x16xf32, #tpu.memory_space<vmem>>, vector<1x16xf32>
    %72 = vector.broadcast %71 : vector<1x16xf32> to vector<128x16xf32>
    %73 = arith.addf %70, %72 : vector<128x16xf32>
    %cst_52 = arith.constant 0.000000e+00 : f32
    %74 = vector.broadcast %cst_52 : f32 to vector<128x16xf32>
    %75 = arith.maximumf %73, %74 : vector<128x16xf32>
    %76 = arith.truncf %75 : vector<128x16xf32> to vector<128x16xbf16>
    %c0_53 = arith.constant 0 : index
    %c0_54 = arith.constant 0 : index
    %77 = vector.load %arg18[%c0_53, %c0_54] : memref<16x8xbf16, #tpu.memory_space<vmem>>, vector<16x8xbf16>
    %cst_55 = arith.constant dense<0.000000e+00> : vector<128x8xf32>
    %78 = tpu.matmul %76, %77, %cst_55 {dimension_numbers = #tpu.dot_dimension_numbers<[1], [0], [0], [1], [0, 0, 1, 1], [], []>} : vector<128x16xbf16>, vector<16x8xbf16>, vector<128x8xf32> -> vector<128x8xf32>
    %c0_56 = arith.constant 0 : index
    %c0_57 = arith.constant 0 : index
    %79 = vector.load %arg19[%c0_56, %c0_57] : memref<1x8xf32, #tpu.memory_space<vmem>>, vector<1x8xf32>
    %80 = vector.broadcast %79 : vector<1x8xf32> to vector<128x8xf32>
    %81 = arith.addf %78, %80 : vector<128x8xf32>
    %cst_58 = arith.constant 0.000000e+00 : f32
    %82 = vector.broadcast %cst_58 : f32 to vector<128x8xf32>
    %83 = arith.maximumf %81, %82 : vector<128x8xf32>
    %c0_59 = arith.constant 0 : index
    %c0_60 = arith.constant 0 : index
    %84 = vector.load %arg20[%c0_59, %c0_60] : memref<1x8xbf16, #tpu.memory_space<vmem>>, vector<1x8xbf16>
    %85 = arith.truncf %83 : vector<128x8xf32> to vector<128x8xbf16>
    %cst_61 = arith.constant dense<0.000000e+00> : vector<1x128xf32>
    %86 = tpu.matmul %84, %85, %cst_61 {dimension_numbers = #tpu.dot_dimension_numbers<[1], [1], [0], [0], [0, 0, 1, 0], [], []>} : vector<1x8xbf16>, vector<128x8xbf16>, vector<1x128xf32> -> vector<1x128xf32>
    %c0_62 = arith.constant 0 : index
    %c0_63 = arith.constant 0 : index
    %87 = vector.load %arg21[%c0_62, %c0_63] : memref<1x1xf32, #tpu.memory_space<vmem>>, vector<1x1xf32>
    %88 = vector.broadcast %87 : vector<1x1xf32> to vector<1x128xf32>
    %89 = arith.addf %86, %88 : vector<1x128xf32>
    %90 = vector.shape_cast %89 : vector<1x128xf32> to vector<1x1x128xf32>
    %c0_64 = arith.constant 0 : index
    %c0_65 = arith.constant 0 : index
    %c0_66 = arith.constant 0 : index
    %91 = vector.load %arg22[%c0_64, %c0_65, %c0_66] : memref<1x1x128xf32, #tpu.memory_space<vmem>>, vector<1x1x128xf32>
    tpu.vector_store %arg22[%c0_64, %c0_65, %c0_66], %90 {strides = array<i32>} : memref<1x1x128xf32, #tpu.memory_space<vmem>>, vector<1x1x128xf32>,
    return
  }
  func.func @transform_0(%arg0: i32) -> (i32, i32) {
    %c0_i32 = arith.constant 0 : i32
    %c0_i32_0 = arith.constant 0 : i32
    return %arg0, %c0_i32 : i32, i32
  }
  func.func @transform_1(%arg0: i32) -> (i32, i32) {
    %c0_i32 = arith.constant 0 : i32
    %c0_i32_0 = arith.constant 0 : i32
    return %arg0, %c0_i32 : i32, i32
  }
  func.func @transform_2(%arg0: i32) -> (i32, i32) {
    %c0_i32 = arith.constant 0 : i32
    %c0_i32_0 = arith.constant 0 : i32
    return %arg0, %c0_i32 : i32, i32
  }
  func.func @transform_3(%arg0: i32) -> (i32, i32) {
    %c0_i32 = arith.constant 0 : i32
    %c0_i32_0 = arith.constant 0 : i32
    return %arg0, %c0_i32 : i32, i32
  }
  func.func @transform_4(%arg0: i32) -> (i32, i32) {
    %c0_i32 = arith.constant 0 : i32
    %c0_i32_0 = arith.constant 0 : i32
    %c0_i32_1 = arith.constant 0 : i32
    return %c0_i32, %c0_i32_0 : i32, i32
  }
  func.func @transform_5(%arg0: i32) -> (i32, i32) {
    %c0_i32 = arith.constant 0 : i32
    %c0_i32_0 = arith.constant 0 : i32
    %c0_i32_1 = arith.constant 0 : i32
    return %c0_i32, %c0_i32_0 : i32, i32
  }
  func.func @transform_6(%arg0: i32) -> (i32, i32) {
    %c0_i32 = arith.constant 0 : i32
    %c0_i32_0 = arith.constant 0 : i32
    %c0_i32_1 = arith.constant 0 : i32
    return %c0_i32, %c0_i32_0 : i32, i32
  }
  func.func @transform_7(%arg0: i32) -> (i32, i32) {
    %c0_i32 = arith.constant 0 : i32
    %c0_i32_0 = arith.constant 0 : i32
    %c0_i32_1 = arith.constant 0 : i32
    return %c0_i32, %c0_i32_0 : i32, i32
  }
  func.func @transform_8(%arg0: i32) -> (i32, i32) {
    %c0_i32 = arith.constant 0 : i32
    %c0_i32_0 = arith.constant 0 : i32
    %c0_i32_1 = arith.constant 0 : i32
    return %c0_i32, %c0_i32_0 : i32, i32
  }
  func.func @transform_9(%arg0: i32) -> (i32, i32) {
    %c0_i32 = arith.constant 0 : i32
    %c0_i32_0 = arith.constant 0 : i32
    %c0_i32_1 = arith.constant 0 : i32
    return %c0_i32, %c0_i32_0 : i32, i32
  }
  func.func @transform_10(%arg0: i32) -> (i32, i32) {
    %c0_i32 = arith.constant 0 : i32
    %c0_i32_0 = arith.constant 0 : i32
    %c0_i32_1 = arith.constant 0 : i32
    return %c0_i32, %c0_i32_0 : i32, i32
  }
  func.func @transform_11(%arg0: i32) -> (i32, i32) {
    %c0_i32 = arith.constant 0 : i32
    %c0_i32_0 = arith.constant 0 : i32
    %c0_i32_1 = arith.constant 0 : i32
    return %c0_i32, %c0_i32_0 : i32, i32
  }
  func.func @transform_12(%arg0: i32) -> (i32, i32) {
    %c0_i32 = arith.constant 0 : i32
    %c0_i32_0 = arith.constant 0 : i32
    %c0_i32_1 = arith.constant 0 : i32
    return %c0_i32, %c0_i32_0 : i32, i32
  }
  func.func @transform_13(%arg0: i32) -> (i32, i32) {
    %c0_i32 = arith.constant 0 : i32
    %c0_i32_0 = arith.constant 0 : i32
    %c0_i32_1 = arith.constant 0 : i32
    return %c0_i32, %c0_i32_0 : i32, i32
  }
  func.func @transform_14(%arg0: i32) -> (i32, i32) {
    %c0_i32 = arith.constant 0 : i32
    %c0_i32_0 = arith.constant 0 : i32
    %c0_i32_1 = arith.constant 0 : i32
    return %c0_i32, %c0_i32_0 : i32, i32
  }
  func.func @transform_15(%arg0: i32) -> (i32, i32) {
    %c0_i32 = arith.constant 0 : i32
    %c0_i32_0 = arith.constant 0 : i32
    %c0_i32_1 = arith.constant 0 : i32
    return %c0_i32, %c0_i32_0 : i32, i32
  }
  func.func @transform_16(%arg0: i32) -> (i32, i32) {
    %c0_i32 = arith.constant 0 : i32
    %c0_i32_0 = arith.constant 0 : i32
    %c0_i32_1 = arith.constant 0 : i32
    return %c0_i32, %c0_i32_0 : i32, i32
  }
  func.func @transform_17(%arg0: i32) -> (i32, i32) {
    %c0_i32 = arith.constant 0 : i32
    %c0_i32_0 = arith.constant 0 : i32
    %c0_i32_1 = arith.constant 0 : i32
    return %c0_i32, %c0_i32_0 : i32, i32
  }
  func.func @transform_18(%arg0: i32) -> (i32, i32) {
    %c0_i32 = arith.constant 0 : i32
    %c0_i32_0 = arith.constant 0 : i32
    %c0_i32_1 = arith.constant 0 : i32
    return %c0_i32, %c0_i32_0 : i32, i32
  }
  func.func @transform_19(%arg0: i32) -> (i32, i32) {
    %c0_i32 = arith.constant 0 : i32
    %c0_i32_0 = arith.constant 0 : i32
    %c0_i32_1 = arith.constant 0 : i32
    return %c0_i32, %c0_i32_0 : i32, i32
  }
  func.func @transform_20(%arg0: i32) -> (i32, i32) {
    %c0_i32 = arith.constant 0 : i32
    %c0_i32_0 = arith.constant 0 : i32
    %c0_i32_1 = arith.constant 0 : i32
    return %c0_i32, %c0_i32_0 : i32, i32
  }
  func.func @transform_21(%arg0: i32) -> (i32, i32, i32) {
    %c0_i32 = arith.constant 0 : i32
    %c0_i32_0 = arith.constant 0 : i32
    %c0_i32_1 = arith.constant 0 : i32
    return %arg0, %c0_i32, %c0_i32_0 : i32, i32, i32
  }
}

</mosaic_0001>

<bundles_post_ra>
// kernel: ncf_forward.1
= control target key start
LH: loop header
LB: loop body
LE: loop exit
PB: predicated region body
PF: predicated region fallthrough
CT: control target
= control target key end

     0   :  { %v2306_v0 = vmov 0   ;;  %s3214_s1 = inlined_call_operand.vmem [shape: s32[128,1], index: 1, kind: input, shape index: {}]   ;;  %s3215_s0 = inlined_call_operand.vmem [shape: s32[128,1], index: 0, kind: input, shape index: {}, may-alias: {0,2,3}]   ;;  %s3216_s4 = inlined_call_operand.vmem [shape: bf16[128,64], index: 4, kind: input, shape index: {}]   ;;  %s3217_s2 = inlined_call_operand.vmem [shape: s32[128,1], index: 2, kind: input, shape index: {}, may-alias: {0,2,3}]   ;;  %s3218_s3 = inlined_call_operand.vmem [shape: s32[128,1], index: 3, kind: input, shape index: {}, may-alias: {0,2,3}]   ;;  %s3219_s5 = inlined_call_operand.vmem [shape: bf16[128,64], index: 5, kind: input, shape index: {}]   ;;  %s3220_s20 = inlined_call_operand.<no memory space> [shape: f32[1,1], index: 20, kind: input, shape index: {}]   ;;  %s3221_s7 = inlined_call_operand.vmem [shape: bf16[128,64], index: 7, kind: input, shape index: {}]   ;;  %s3222_s9 = inlined_call_operand.vmem [shape: bf16[64,64], index: 9, kind: input, shape index: {}]   ;;  %s3223_s8 = inlined_call_operand.vmem [shape: bf16[64,64], index: 8, kind: input, shape index: {}]   ;;  %s3224_s6 = inlined_call_operand.vmem [shape: bf16[128,64], index: 6, kind: input, shape index: {}]   ;;  %s3225_s11 = inlined_call_operand.vmem [shape: bf16[64,64], index: 11, kind: input, shape index: {}]   ;;  %s3226_s10 = inlined_call_operand.vmem [shape: bf16[64,64], index: 10, kind: input, shape index: {}]   ;;  %s3227_s12 = inlined_call_operand.vmem [shape: f32[1,64], index: 12, kind: input, shape index: {}]   ;;  %s3228_s13 = inlined_call_operand.vmem [shape: bf16[64,32], index: 13, kind: input, shape index: {}]   ;;  %s3229_s14 = inlined_call_operand.vmem [shape: f32[1,32], index: 14, kind: input, shape index: {}]   ;;  %s3230_s15 = inlined_call_operand.vmem [shape: bf16[32,16], index: 15, kind: input, shape index: {}]   ;;  %s3231_s16 = inlined_call_operand.vmem [shape: f32[1,16], index: 16, kind: input, shape index: {}]   ;;  %s3232_s17 = inlined_call_operand.vmem [shape: bf16[16,8], index: 17, kind: input, shape index: {}]   ;;  %s3233_s18 = inlined_call_operand.vmem [shape: f32[1,8], index: 18, kind: input, shape index: {}]   ;;  %s3234_s19 = inlined_call_operand.vmem [shape: bf16[1,8], index: 19, kind: input, shape index: {}]   ;;  %s3235_s21 = inlined_call_operand.vmem [shape: f32[1,1,128], index: 21, kind: output, shape index: {}]  }
   0x1   :  { %3242 = sst [smem:[#allocation3_spill]] %s3214_s1  ;;  %2301 = vset.pattern.permute.xlu2 %v2306_v0  ;;  %2300 = vset.pattern.permute.xlu1 %v2306_v0 }
   0x2   :  { %3243 = sst [smem:[#allocation4_spill]] %s3215_s0  ;;  %2299 = vset.pattern.permute.xlu0 %v2306_v0 }
   0x3   :  { %3244 = sst [smem:[#allocation5_spill]] %s3216_s4 }
   0x4   :  { %3245 = sst [smem:[#allocation6_spill]] %s3217_s2 }
   0x5   :  { %3246 = sst [smem:[#allocation7_spill]] %s3218_s3 }
   0x6   :  { %3247 = sst [smem:[#allocation8_spill]] %s3219_s5 }
   0x7   :  { %s3248_s26 = sld [smem:[#allocation3_spill]] }
   0x8   :  { %s3249_s28 = sld [smem:[#allocation4_spill]] }
   0x9   :  { %s3250_s23 = sld [smem:[#allocation5_spill]] }
   0xa   :  { %s3251_s30 = sld [smem:[#allocation6_spill]] }
   0xb   :  { %s3252_s1 = sld [smem:[#allocation7_spill]] }
   0xc   :  { %s3253_s5 = sld [smem:[#allocation8_spill]] }
   0xd   :  { %v306_v1 = vld [vmem:[%s3248_s26] sm:$0xff]  ;;  %v307_v4 = vld [vmem:[%s3248_s26 + $0x8] sm:$0xff]  ;;  %v309_v8 = vld [vmem:[%s3248_s26 + $0x18] sm:$0xff] }
   0xe   :  { %v85_v2 = vld [vmem:[%s3249_s28 + $0x70] sm:$0xff]  ;;  %v83_v3 = vld [vmem:[%s3249_s28 + $0x60] sm:$0xff]  ;;  %323 = vperm.xlu2 %2301, %v306_v1   ;;  %v86_v5 = vld [vmem:[%s3249_s28 + $0x78] sm:$0xff] }
   0xf   :  { %132 = vperm.xlu1 %2300, %v85_v2   ;;  %126 = vperm.xlu0 %2299, %v83_v3   ;;  %v84_v6 = vld [vmem:[%s3249_s28 + $0x68] sm:$0xff]  ;;  %v310_v7 = vld [vmem:[%s3248_s26 + $0x20] sm:$0xff]  ;;  %v308_v9 = vld [vmem:[%s3248_s26 + $0x10] sm:$0xff]  ;;  %v87_v2 = vlaneseq }
  0x10   :  { %v313_v10 = vld [vmem:[%s3248_s26 + $0x38] sm:$0xff]  ;;  %v312_v11 = vld [vmem:[%s3248_s26 + $0x30] sm:$0xff]  ;;  %v311_v12 = vld [vmem:[%s3248_s26 + $0x28] sm:$0xff] }
  0x11   :  { %v316_v13 = vld [vmem:[%s3248_s26 + $0x50] sm:$0xff]  ;;  %v315_v14 = vld [vmem:[%s3248_s26 + $0x48] sm:$0xff]  ;;  %v314_v15 = vld [vmem:[%s3248_s26 + $0x40] sm:$0xff] }
  0x12   :  { %v319_v16 = vld [vmem:[%s3248_s26 + $0x68] sm:$0xff]  ;;  %v318_v17 = vld [vmem:[%s3248_s26 + $0x60] sm:$0xff]  ;;  %v317_v18 = vld [vmem:[%s3248_s26 + $0x58] sm:$0xff] }
  0x13   :  { %v71_v19 = vld [vmem:[%s3249_s28] sm:$0xff]  ;;  %v321_v20 = vld [vmem:[%s3248_s26 + $0x78] sm:$0xff]  ;;  %v320_v21 = vld [vmem:[%s3248_s26 + $0x70] sm:$0xff] }
  0x14   :  { %v74_v22 = vld [vmem:[%s3249_s28 + $0x18] sm:$0xff]  ;;  %v73_v23 = vld [vmem:[%s3249_s28 + $0x10] sm:$0xff]  ;;  %v72_v24 = vld [vmem:[%s3249_s28 + $0x8] sm:$0xff] }
  0x15   :  { %v2233_v25 = vld [vmem:[%s3250_s23 + $0x38] sm:$0xff]  ;;  %v77_v26 = vld [vmem:[%s3249_s28 + $0x30] sm:$0xff]  ;;  %v76_v27 = vld [vmem:[%s3249_s28 + $0x28] sm:$0xff] }
  0x16   :  { %326 = vperm.xlu2 %2301, %v307_v4   ;;  %2281 = vmatpush.bf16.msra.mxu1 %v2233_v25  ;;  %v75_v28 = vld [vmem:[%s3249_s28 + $0x20] sm:$0xff]  ;;  %v2232_v29 = vld [vmem:[%s3250_s23 + $0x30] sm:$0xff]  ;;  %v2231_v30 = vld [vmem:[%s3250_s23 + $0x28] sm:$0xff] }
  0x17   :  { %135 = vperm.xlu1 %2300, %v86_v5   ;;  %129 = vperm.xlu0 %2299, %v84_v6   ;;  %v80_v31 = vld [vmem:[%s3249_s28 + $0x48] sm:$0xff]  ;;  %v79_v32 = vld [vmem:[%s3249_s28 + $0x40] sm:$0xff]  ;;  %v78_v33 = vld [vmem:[%s3249_s28 + $0x38] sm:$0xff] }
  0x18   :  { %241 = vmatpush.bf16.msra.mxu0 %v2233_v25  ;;  %v2230_v34 = vld [vmem:[%s3250_s23 + $0x20] sm:$0xff]  ;;  %v2229_v35 = vld [vmem:[%s3250_s23 + $0x18] sm:$0xff]  ;;  %v81_v38 = vld [vmem:[%s3249_s28 + $0x50] sm:$0xff] }
  0x19   :  { %v734_v36 = vld [vmem:[%s3251_s30] sm:$0xff]  ;;  %v82_v37 = vld [vmem:[%s3249_s28 + $0x58] sm:$0xff]  ;;  %v2228_v39 = vld [vmem:[%s3250_s23 + $0x10] sm:$0xff] }
  0x1a   :  { %2282 = vmatpush.bf16.msra.mxu1 %v2232_v29  ;;  %v2227_v40 = vld [vmem:[%s3250_s23 + $0x8] sm:$0xff]  ;;  %v1080_v42 = vld [vmem:[%s3252_s1] sm:$0xff]  ;;  %v1082_v46 = vld [vmem:[%s3252_s1 + $0x10] sm:$0xff] }
  0x1b   :  { %v1081_v41 = vld [vmem:[%s3252_s1 + $0x8] sm:$0xff]  ;;  %v2226_v44 = vld [vmem:[%s3250_s23] sm:$0xff]  ;;  %v737_v47 = vld [vmem:[%s3251_s30 + $0x18] sm:$0xff] }
  0x1c   :  { %242 = vmatpush.bf16.msra.mxu0 %v2232_v29  ;;  %v735_v43 = vld [vmem:[%s3251_s30 + $0x8] sm:$0xff]  ;;  %v736_v48 = vld [vmem:[%s3251_s30 + $0x10] sm:$0xff]  ;;  %v2245_v49 = vld [vmem:[%s3253_s5 + $0x38] sm:$0xff] }
  0x1d   :  { %v2244_v50 = vld [vmem:[%s3253_s5 + $0x30] sm:$0xff]  ;;  %v739_v52 = vld [vmem:[%s3251_s30 + $0x28] sm:$0xff]  ;;  %v738_v54 = vld [vmem:[%s3251_s30 + $0x20] sm:$0xff] }
  0x1e   :  { %335 = vperm.xlu2 %2301, %v310_v7   ;;  %2283 = vmatpush.bf16.msra.mxu1 %v2231_v30  ;;  %v2243_v53 = vld [vmem:[%s3253_s5 + $0x28] sm:$0xff]  ;;  %v1083_v55 = vld [vmem:[%s3252_s1 + $0x18] sm:$0xff]  ;;  %v2242_v56 = vld [vmem:[%s3253_s5 + $0x20] sm:$0xff]  ;;  %v2615_v7 = vand.u32 127, %v87_v2 }
  0x1f   :  { %332 = vperm.xlu1 %2300, %v309_v8   ;;  %329 = vperm.xlu0 %2299, %v308_v9   ;;  %v740_v58 = vld [vmem:[%s3251_s30 + $0x30] sm:$0xff]  ;;  %v1085_v59 = vld [vmem:[%s3252_s1 + $0x28] sm:$0xff]  ;;  %v1084_v60 = vld [vmem:[%s3252_s1 + $0x20] sm:$0xff] }
  0x20   :  { %243 = vmatpush.bf16.msra.mxu0 %v2231_v30  ;;  %v2241_v61 = vld [vmem:[%s3253_s5 + $0x18] sm:$0xff]  ;;  %v2240_v62 = vld [vmem:[%s3253_s5 + $0x10] sm:$0xff]  ;;  %v2239_v4 = vld [vmem:[%s3253_s5 + $0x8] sm:$0xff] }
  0x21   :  { %v1087_v3 = vld [vmem:[%s3252_s1 + $0x38] sm:$0xff]  ;;  %v1086_v5 = vld [vmem:[%s3252_s1 + $0x30] sm:$0xff]  ;;  %v2238_v8 = vld [vmem:[%s3253_s5] sm:$0xff] }
  0x22   :  { %2284 = vmatpush.bf16.msra.mxu1 %v2230_v34  ;;  %v741_v6 = vld [vmem:[%s3251_s30 + $0x38] sm:$0xff] }
  0x24   :  { %244 = vmatpush.bf16.msra.mxu0 %v2230_v34  ;;  %v747_v34 = vld [vmem:[%s3251_s30 + $0x68] sm:$0xff] }
  0x26   :  { %344 = vperm.xlu2 %2301, %v313_v10   ;;  %2285 = vmatpush.bf16.msra.mxu1 %v2229_v35 }
  0x27   :  { %341 = vperm.xlu1 %2300, %v312_v11   ;;  %338 = vperm.xlu0 %2299, %v311_v12   ;;  %v1088_v12 = vld [vmem:[%s3252_s1 + $0x40] sm:$0xff] }
  0x28   :  { %245 = vmatpush.bf16.msra.mxu0 %v2229_v35 }
  0x2a   :  { %2286 = vmatpush.bf16.msra.mxu1 %v2228_v39 }
  0x2c   :  { %246 = vmatpush.bf16.msra.mxu0 %v2228_v39  ;;  %v2237_v39 = vld [vmem:[%s3223_s8 + $0x18] sm:$0xff] }
  0x2d   :  { %2293 = vmatpush.bf16.msra.mxu3 %v2237_v39 }
  0x2e   :  { %353 = vperm.xlu2 %2301, %v316_v13   ;;  %2287 = vmatpush.bf16.msra.mxu1 %v2227_v40  ;;  %v743_v13 = vld [vmem:[%s3251_s30 + $0x48] sm:$0xff] }
  0x2f   :  { %350 = vperm.xlu1 %2300, %v315_v14   ;;  %347 = vperm.xlu0 %2299, %v314_v15   ;;  %v742_v14 = vld [vmem:[%s3251_s30 + $0x40] sm:$0xff]  ;;  %v2307_v15 = vmov 1.0|1.0  }
  0x30   :  { %247 = vmatpush.bf16.msra.mxu0 %v2227_v40 }
  0x32   :  { %2288 = vmatpush.bf16.msra.mxu1 %v2226_v44 }
  0x34   :  { %248 = vmatpush.bf16.msra.mxu0 %v2226_v44 }
  0x36   :  { %362 = vperm.xlu2 %2301, %v319_v16   ;;  %474 = vmatpush.bf16.msrb.mxu1 %v2245_v49  ;;  %v26_v16 = vstv %s3220_s20 }
  0x37   :  { %359 = vperm.xlu1 %2300, %v318_v17   ;;  %356 = vperm.xlu0 %2299, %v317_v18   ;;  %27 = vst [vmem:[#allocation2] sm:$0x1] %v26_v16 }
  0x3a   :  { %475 = vmatpush.bf16.msrb.mxu1 %v2244_v50 }
  0x3e   :  { %90 = vperm.xlu2 %2301, %v71_v19   ;;  %476 = vmatpush.bf16.msrb.mxu1 %v2243_v53 }
  0x3f   :  { %368 = vperm.xlu1 %2300, %v321_v20   ;;  %365 = vperm.xlu0 %2299, %v320_v21   ;;  %v745_v20 = vld [vmem:[%s3251_s30 + $0x58] sm:$0xff]  ;;  %v744_v21 = vld [vmem:[%s3251_s30 + $0x50] sm:$0xff] }
  0x42   :  { %477 = vmatpush.bf16.msrb.mxu1 %v2242_v56 }
  0x46   :  { %99 = vperm.xlu2 %2301, %v74_v22   ;;  %478 = vmatpush.bf16.msrb.mxu1 %v2241_v61  ;;  %v1089_v22 = vld [vmem:[%s3252_s1 + $0x48] sm:$0xff] }
  0x47   :  { %96 = vperm.xlu1 %2300, %v73_v23   ;;  %93 = vperm.xlu0 %2299, %v72_v24  }
  0x4a   :  { %479 = vmatpush.bf16.msrb.mxu1 %v2240_v62 }
  0x4e   :  { %108 = vperm.xlu2 %2301, %v77_v26   ;;  %480 = vmatpush.bf16.msrb.mxu1 %v2239_v4  ;;  %v746_v26 = vld [vmem:[%s3251_s30 + $0x60] sm:$0xff] }
  0x4f   :  { %105 = vperm.xlu1 %2300, %v76_v27   ;;  %102 = vperm.xlu0 %2299, %v75_v28   ;;  %v1091_v27 = vld [vmem:[%s3252_s1 + $0x58] sm:$0xff]  ;;  %v1090_v28 = vld [vmem:[%s3252_s1 + $0x50] sm:$0xff] }
  0x52   :  { %481 = vmatpush.bf16.msrb.mxu1 %v2238_v8  ;;  %v2266_v8 = vld [vmem:[%s3221_s7 + $0x20] sm:$0xff] }
  0x56   :  { %117 = vperm.xlu2 %2301, %v80_v31  }
  0x57   :  { %114 = vperm.xlu1 %2300, %v79_v32   ;;  %111 = vperm.xlu0 %2299, %v78_v33   ;;  %v1093_v32 = vld [vmem:[%s3252_s1 + $0x68] sm:$0xff]  ;;  %v1092_v33 = vld [vmem:[%s3252_s1 + $0x60] sm:$0xff] }
  0x5e   :  { %751 = vperm.xlu2 %2301, %v734_v36  }
  0x5f   :  { %123 = vperm.xlu1 %2300, %v82_v37   ;;  %120 = vperm.xlu0 %2299, %v81_v38   ;;  %v1094_v38 = vld [vmem:[%s3252_s1 + $0x70] sm:$0xff] }
  0x66   :  { %1100 = vperm.xlu2 %2301, %v1081_v41   ;;  %v749_v41 = vld [vmem:[%s3251_s30 + $0x78] sm:$0xff] }
  0x67   :  { %1097 = vperm.xlu1 %2300, %v1080_v42   ;;  %754 = vperm.xlu0 %2299, %v735_v43   ;;  %v748_v42 = vld [vmem:[%s3251_s30 + $0x70] sm:$0xff] }
  0x68   :  { %v2550_v45 = vpop.permute.xlu2 %323 }
  0x69   :  { %vm370_vm6 = vcmp.eq.s32.totalorder %v2550_v45, %v2615_v7 }
  0x6e   :  { %1103 = vperm.xlu2 %2301, %v1082_v46   ;;  %v1832_v46 = vld [vmem:[#allocation2] sm:$0x1] }
  0x6f   :  { %760 = vperm.xlu1 %2300, %v737_v47   ;;  %757 = vperm.xlu0 %2299, %v736_v48   ;;  %v1095_v47 = vld [vmem:[%s3252_s1 + $0x78] sm:$0xff] }
  0x70   :  { %v2567_v51 = vpop.permute.xlu2 %326 }
  0x71   :  { %vm371_vm7 = vcmp.eq.s32.totalorder %v2567_v51, %v2615_v7 }
  0x72   :  { %vm1965_vm8 = vmpackc.low %vm371_vm7, %vm370_vm6 }
  0x76   :  { %766 = vperm.xlu2 %2301, %v739_v52  }
  0x77   :  { %763 = vperm.xlu1 %2300, %v738_v54   ;;  %1106 = vperm.xlu0 %2299, %v1083_v55  }
  0x78   :  { %v2584_v57 = vpop.permute.xlu2 %335 }
  0x7e   :  { %769 = vperm.xlu2 %2301, %v740_v58  }
  0x7f   :  { %1112 = vperm.xlu1 %2300, %v1085_v59   ;;  %1109 = vperm.xlu0 %2299, %v1084_v60  }
  0x80   :  { %v2601_v63 = vpop.permute.xlu2 %344 }
  0x81   :  { %v133_v0 = vpop.permute.xlu1 %132  ;;  %v127_v1 = vpop.permute.xlu0 %126 }
  0x82   :  { %vm149_vm1 = vcmp.eq.s32.totalorder %v127_v1, %v2615_v7  ;;  %vm151_vm3 = vcmp.eq.s32.totalorder %v133_v0, %v2615_v7  ;;  %v2268_v1 = vld [vmem:[%s3221_s7 + $0x30] sm:$0xff] }
  0x86   :  { %1118 = vperm.xlu2 %2301, %v1087_v3  }
  0x87   :  { %1115 = vperm.xlu1 %2300, %v1086_v5   ;;  %772 = vperm.xlu0 %2299, %v741_v6   ;;  %v2267_v5 = vld [vmem:[%s3221_s7 + $0x28] sm:$0xff] }
  0x88   :  { %v354_v9 = vpop.permute.xlu2 %353 }
  0x89   :  { %v136_v10 = vpop.permute.xlu1 %135  ;;  %v130_v11 = vpop.permute.xlu0 %129  ;;  %vm380_vm12 = vcmp.eq.s32.totalorder %v354_v9, %v2615_v7 }
  0x8a   :  { %vm150_vm0 = vcmp.eq.s32.totalorder %v130_v11, %v2615_v7  ;;  %vm152_vm4 = vcmp.eq.s32.totalorder %v136_v10, %v2615_v7 }
  0x8b   :  { %vm1929_vm2 = vmpackc.low %vm150_vm0, %vm149_vm1 }
  0x8c   :  { %1930 = vmatmul.msk.bf16.vlgmr.msra.gmra.mxu1 %vm1929_vm2, %v2307_v15  ;;  %vm1931_vm5 = vmpackc.low %vm152_vm4, %vm151_vm3 }
  0x8e   :  { %1121 = vperm.xlu2 %2301, %v1088_v12   ;;  %v2265_v12 = vld [vmem:[%s3221_s7 + $0x18] sm:$0xff] }
  0x8f   :  { %778 = vperm.xlu1 %2300, %v743_v13   ;;  %775 = vperm.xlu0 %2299, %v742_v14   ;;  %v2264_v13 = vld [vmem:[%s3221_s7 + $0x10] sm:$0xff] }
  0x90   :  { %v363_v17 = vpop.permute.xlu2 %362 }
  0x91   :  { %v2635_v18 = vpop.permute.xlu1 %332  ;;  %v2637_v19 = vpop.permute.xlu0 %329  ;;  %vm383_vm9 = vcmp.eq.s32.totalorder %v363_v17, %v2615_v7 }
  0x92   :  { %vm373_vm2 = vcmp.eq.s32.totalorder %v2635_v18, %v2615_v7  ;;  %vm372_vm3 = vcmp.eq.s32.totalorder %v2637_v19, %v2615_v7  ;;  %v2263_v18 = vld [vmem:[%s3221_s7 + $0x8] sm:$0xff]  ;;  %v2262_v19 = vld [vmem:[%s3221_s7] sm:$0xff] }
  0x96   :  { %784 = vperm.xlu2 %2301, %v745_v20  }
  0x97   :  { %781 = vperm.xlu1 %2300, %v744_v21   ;;  %1124 = vperm.xlu0 %2299, %v1089_v22  }
  0x98   :  { %v91_v23 = vpop.permute.xlu2 %90 }
  0x99   :  { %v2650_v24 = vpop.permute.xlu1 %341  ;;  %v2652_v25 = vpop.permute.xlu0 %338  ;;  %vm137_vm6 = vcmp.eq.s32.totalorder %v91_v23, %v2615_v7 }
  0x9c   :  { %1932 = vmatmul.msk.bf16.gmra.mxu1 %vm1931_vm5, %v2307_v15  ;;  %vm1967_vm5 = vmpackc.low %vm373_vm2, %vm372_vm3  ;;  %vm376_vm2 = vcmp.eq.s32.totalorder %v2650_v24, %v2615_v7 }
  0x9e   :  { %787 = vperm.xlu2 %2301, %v746_v26  }
  0x9f   :  { %1130 = vperm.xlu1 %2300, %v1091_v27   ;;  %1127 = vperm.xlu0 %2299, %v1090_v28   ;;  %v2249_v27 = vld [vmem:[%s3222_s9 + $0x18] sm:$0xff] }
  0xa0   :  { %v100_v31 = vpop.permute.xlu2 %99  ;;  %592 = vmatpush.bf16.msra.mxu1 %v2249_v27  ;;  %2289 = vmatpush.bf16.msra.mxu2 %v2249_v27  ;;  %v2271_v27 = vld [vmem:[%s3225_s11 + $0x8] sm:$0xff] }
  0xa1   :  { %v2664_v29 = vpop.permute.xlu1 %350  ;;  %v2666_v30 = vpop.permute.xlu0 %347 }
  0xa6   :  { %1136 = vperm.xlu2 %2301, %v1093_v32  }
  0xa7   :  { %1133 = vperm.xlu1 %2300, %v1092_v33   ;;  %790 = vperm.xlu0 %2299, %v747_v34   ;;  %v2247_v34 = vld [vmem:[%s3222_s9 + $0x8] sm:$0xff] }
  0xa8   :  { %v2696_v40 = vpop.permute.xlu2 %108 }
  0xa9   :  { %v360_v35 = vpop.permute.xlu1 %359  ;;  %v357_v36 = vpop.permute.xlu0 %356 }
  0xaa   :  { %vm382_vm10 = vcmp.eq.s32.totalorder %v360_v35, %v2615_v7  ;;  %vm381_vm11 = vcmp.eq.s32.totalorder %v357_v36, %v2615_v7  ;;  %v2246_v35 = vld [vmem:[%s3222_s9] sm:$0xff] }
  0xab   :  { %vm2685_vm13 = vmpackc.low %vm383_vm9, %vm382_vm10  ;;  %vm375_vm9 = vcmp.eq.s32.totalorder %v2652_v25, %v2615_v7 }
  0xac   :  { %vm2692_vm14 = vmpackc.low %vm381_vm11, %vm380_vm12  ;;  %1966 = vmatmul.msk.bf16.vlgmr.msrb.gmra.mxu1 %vm1965_vm8, %v2307_v15  ;;  %vm374_vm8 = vcmp.eq.s32.totalorder %v2584_v57, %v2615_v7  ;;  %vm140_vm12 = vcmp.eq.s32.totalorder %v100_v31, %v2615_v7 }
  0xad   :  { %vm1969_vm11 = vmpackc.low %vm375_vm9, %vm374_vm8 }
  0xae   :  { %1139 = vperm.xlu2 %2301, %v1094_v38  }
  0xaf   :  { %796 = vperm.xlu1 %2300, %v749_v41   ;;  %793 = vperm.xlu0 %2299, %v748_v42  }
  0xb0   :  { %v2714_v48 = vpop.permute.xlu2 %117 }
  0xb1   :  { %v369_v43 = vpop.permute.xlu1 %368  ;;  %v366_v44 = vpop.permute.xlu0 %365 }
  0xb2   :  { %vm385_vm15 = vcmp.eq.s32.totalorder %v369_v43, %v2615_v7  ;;  %vm384_vm0 = vcmp.eq.s32.totalorder %v366_v44, %v2615_v7  ;;  %v2235_v44 = vld [vmem:[%s3223_s8 + $0x8] sm:$0xff] }
  0xb3   :  { %vm2707_vm1 = vmpackc.low %vm385_vm15, %vm384_vm0  ;;  %vm377_vm0 = vcmp.eq.s32.totalorder %v2601_v63, %v2615_v7  ;;  %v2269_v63 = vld [vmem:[%s3221_s7 + $0x38] sm:$0xff] }
  0xb4   :  { %1248 = vmatpush.bf16.msrb.mxu0 %v2269_v63 }
  0xb7   :  { %1835 = vperm.xlu1 %2300, %v1832_v46   ;;  %1142 = vperm.xlu0 %2299, %v1095_v47   ;;  %v2234_v46 = vld [vmem:[%s3223_s8] sm:$0xff] }
  0xb8   :  { %v752_v51 = vpop.permute.xlu2 %751  ;;  %1249 = vmatpush.bf16.msrb.mxu0 %v2268_v1 }
  0xb9   :  { %v97_v49 = vpop.permute.xlu1 %96  ;;  %v94_v50 = vpop.permute.xlu0 %93 }
  0xba   :  { %vm138_vm4 = vcmp.eq.s32.totalorder %v94_v50, %v2615_v7  ;;  %vm139_vm10 = vcmp.eq.s32.totalorder %v97_v49, %v2615_v7 }
  0xbb   :  { %vm1917_vm7 = vmpackc.low %vm138_vm4, %vm137_vm6 }
  0xbc   :  { %1918 = vmatmul.msk.bf16.vlgmr.msra.gmra.mxu0 %vm1917_vm7, %v2307_v15  ;;  %1968 = vmatmul.msk.bf16.gmra.mxu1 %vm1967_vm5, %v2307_v15  ;;  %vm1919_vm15 = vmpackc.low %vm140_vm12, %vm139_vm10  ;;  %vm798_vm7 = vcmp.eq.s32.totalorder %v752_v51, %v2615_v7 }
  0xbd   :  { %vm1971_vm5 = vmpackc.low %vm377_vm0, %vm376_vm2  ;;  %1250 = vmatpush.bf16.msrb.mxu0 %v2267_v5  ;;  %vm378_vm0 = vcmp.eq.s32.totalorder %v2666_v30, %v2615_v7 }
  0xc0   :  { %v2731_v56 = vpop.permute.xlu2 %1100 }
  0xc1   :  { %v106_v52 = vpop.permute.xlu1 %105  ;;  %v103_v53 = vpop.permute.xlu0 %102  ;;  %1251 = vmatpush.bf16.msrb.mxu0 %v2266_v8 }
  0xc2   :  { %vm142_vm3 = vcmp.eq.s32.totalorder %v106_v52, %v2615_v7  ;;  %vm141_vm4 = vcmp.eq.s32.totalorder %v103_v53, %v2615_v7 }
  0xc3   :  { %vm1921_vm8 = vmpackc.low %vm142_vm3, %vm141_vm4 }
  0xc5   :  { %1252 = vmatpush.bf16.msrb.mxu0 %v2265_v12 }
  0xc8   :  { %v2740_v59 = vpop.permute.xlu2 %1103 }
  0xc9   :  { %v2729_v54 = vpop.permute.xlu1 %114  ;;  %v112_v55 = vpop.permute.xlu0 %111  ;;  %1253 = vmatpush.bf16.msrb.mxu0 %v2264_v13 }
  0xca   :  { %vm144_vm2 = vcmp.eq.s32.totalorder %v112_v55, %v2615_v7 }
  0xcc   :  { %1920 = vmatmul.msk.bf16.gmra.mxu0 %vm1919_vm15, %v2307_v15  ;;  %1970 = vmatmul.msk.bf16.gmra.mxu1 %vm1969_vm11, %v2307_v15  ;;  %vm379_vm15 = vcmp.eq.s32.totalorder %v2664_v29, %v2615_v7  ;;  %v2248_v29 = vld [vmem:[%s3222_s9 + $0x10] sm:$0xff] }
  0xcd   :  { %vm1973_vm3 = vmpackc.low %vm379_vm15, %vm378_vm0  ;;  %1254 = vmatpush.bf16.msrb.mxu0 %v2263_v18  ;;  %593 = vmatpush.bf16.msra.mxu1 %v2248_v29  ;;  %v2273_v18 = vld [vmem:[%s3225_s11 + $0x18] sm:$0xff] }
  0xce   :  { %2290 = vmatpush.bf16.msra.mxu2 %v2248_v29  ;;  %v2254_v29 = vld [vmem:[%s3224_s6 + $0x20] sm:$0xff] }
  0xd0   :  { %v767_v0 = vpop.permute.xlu2 %766 }
  0xd1   :  { %v2736_v58 = vpop.permute.xlu1 %123  ;;  %v2738_v57 = vpop.permute.xlu0 %120  ;;  %vm803_vm4 = vcmp.eq.s32.totalorder %v767_v0, %v2615_v7  ;;  %1255 = vmatpush.bf16.msrb.mxu0 %v2262_v19  ;;  %594 = vmatpush.bf16.msra.mxu1 %v2247_v34 }
  0xd2   :  { %2291 = vmatpush.bf16.msra.mxu2 %v2247_v34 }
  0xd5   :  { %595 = vmatpush.bf16.msra.mxu1 %v2246_v35 }
  0xd6   :  { %2292 = vmatpush.bf16.msra.mxu2 %v2246_v35 }
  0xd8   :  { %v770_v6 = vpop.permute.xlu2 %769 }
  0xd9   :  { %v2748_v60 = vpop.permute.xlu1 %1097  ;;  %v755_v61 = vpop.permute.xlu0 %754  ;;  %689 = vmatpush.bf16.msrb.mxu1 %v2237_v39  ;;  %v2253_v39 = vld [vmem:[%s3224_s6 + $0x18] sm:$0xff] }
  0xda   :  { %vm799_vm6 = vcmp.eq.s32.totalorder %v755_v61, %v2615_v7 }
  0xdb   :  { %vm2752_vm9 = vmpackc.low %vm799_vm6, %vm798_vm7  ;;  %vm143_vm6 = vcmp.eq.s32.totalorder %v2696_v40, %v2615_v7  ;;  %v2236_v40 = vld [vmem:[%s3223_s8 + $0x10] sm:$0xff] }
  0xdc   :  { %1922 = vmatmul.msk.bf16.gmra.mxu0 %vm1921_vm8, %v2307_v15  ;;  %1972 = vmatmul.msk.bf16.gmra.mxu1 %vm1971_vm5, %v2307_v15  ;;  %vm1923_vm8 = vmpackc.low %vm144_vm2, %vm143_vm6  ;;  %vm804_vm2 = vcmp.eq.s32.totalorder %v770_v6, %v2615_v7  ;;  %v2257_v6 = vld [vmem:[%s3224_s6 + $0x38] sm:$0xff] }
  0xdd   :  { %690 = vmatpush.bf16.msrb.mxu1 %v2236_v40  ;;  %2294 = vmatpush.bf16.msra.mxu3 %v2236_v40  ;;  %v2252_v40 = vld [vmem:[%s3224_s6 + $0x10] sm:$0xff] }
  0xde   :  { %902 = vmatpush.bf16.msrb.mxu2 %v2257_v6 }
  0xe0   :  { %v2803_v17 = vpop.permute.xlu2 %1118 }
  0xe1   :  { %v761_v2 = vpop.permute.xlu1 %760  ;;  %v758_v3 = vpop.permute.xlu0 %757  ;;  %691 = vmatpush.bf16.msrb.mxu1 %v2235_v44  ;;  %2295 = vmatpush.bf16.msra.mxu3 %v2235_v44 }
  0xe2   :  { %vm801_vm10 = vcmp.eq.s32.totalorder %v761_v2, %v2615_v7  ;;  %vm800_vm11 = vcmp.eq.s32.totalorder %v758_v3, %v2615_v7 }
  0xe3   :  { %vm2766_vm12 = vmpackc.low %vm801_vm10, %vm800_vm11  ;;  %vm145_vm10 = vcmp.eq.s32.totalorder %v2729_v54, %v2615_v7  ;;  %vm146_vm11 = vcmp.eq.s32.totalorder %v2714_v48, %v2615_v7 }
  0xe4   :  { %vm1925_vm0 = vmpackc.low %vm146_vm11, %vm145_vm10 }
  0xe5   :  { %692 = vmatpush.bf16.msrb.mxu1 %v2234_v46  ;;  %2296 = vmatpush.bf16.msra.mxu3 %v2234_v46 }
  0xe8   :  { %v2823_v23 = vpop.permute.xlu2 %1121 }
  0xe9   :  { %v764_v9 = vpop.permute.xlu1 %763  ;;  %v2781_v10 = vpop.permute.xlu0 %1106 }
  0xea   :  { %vm802_vm5 = vcmp.eq.s32.totalorder %v764_v9, %v2615_v7 }
  0xeb   :  { %vm2787_vm7 = vmpackc.low %vm803_vm4, %vm802_vm5 }
  0xec   :  { %1924 = vmatmul.msk.bf16.gmra.mxu0 %vm1923_vm8, %v2307_v15  ;;  %1974 = vmatmul.msk.bf16.gmra.mxu1 %vm1973_vm3, %v2307_v15  ;;  %vm147_vm8 = vcmp.eq.s32.totalorder %v2738_v57, %v2615_v7 }
  0xf0   :  { %v785_v28 = vpop.permute.xlu2 %784 }
  0xf1   :  { %v2799_v14 = vpop.permute.xlu1 %1112  ;;  %v2801_v16 = vpop.permute.xlu0 %1109  ;;  %vm809_vm10 = vcmp.eq.s32.totalorder %v785_v28, %v2615_v7 }
  0xf8   :  { %v788_v37 = vpop.permute.xlu2 %787 }
  0xf9   :  { %v2813_v20 = vpop.permute.xlu1 %1115  ;;  %v773_v21 = vpop.permute.xlu0 %772 }
  0xfa   :  { %vm805_vm15 = vcmp.eq.s32.totalorder %v773_v21, %v2615_v7  ;;  %v2272_v21 = vld [vmem:[%s3225_s11 + $0x10] sm:$0xff] }
  0xfb   :  { %vm2819_vm3 = vmpackc.low %vm805_vm15, %vm804_vm2  ;;  %vm1145_vm2 = vcmp.eq.s32.totalorder %v2731_v56, %v2615_v7 }
  0xfc   :  { %1926 = vmatmul.msk.bf16.gmra.mxu0 %vm1925_vm0, %v2307_v15  ;;  %1976 = vmatmul.msk.bf16.gmra.mxu1 %vm2692_vm14, %v2307_v15  ;;  %vm148_vm14 = vcmp.eq.s32.totalorder %v2736_v58, %v2615_v7 }
  0xfd   :  { %vm1927_vm0 = vmpackc.low %vm148_vm14, %vm147_vm8  ;;  %vm810_vm14 = vcmp.eq.s32.totalorder %v788_v37, %v2615_v7 }
 0x101   :  { %v779_v24 = vpop.permute.xlu1 %778  ;;  %v776_v25 = vpop.permute.xlu0 %775 }
 0x102   :  { %vm807_vm4 = vcmp.eq.s32.totalorder %v779_v24, %v2615_v7  ;;  %vm806_vm5 = vcmp.eq.s32.totalorder %v776_v25, %v2615_v7  ;;  %v2255_v25 = vld [vmem:[%s3224_s6 + $0x28] sm:$0xff] }
 0x103   :  { %vm2831_vm6 = vmpackc.low %vm807_vm4, %vm806_vm5 }
 0x109   :  { %v782_v30 = vpop.permute.xlu1 %781  ;;  %v2845_v31 = vpop.permute.xlu0 %1124 }
 0x10a   :  { %v2848_v32 = vpop.f32.mrf.mxu1  ;;  %vm808_vm11 = vcmp.eq.s32.totalorder %v782_v30, %v2615_v7  ;;  %v2270_v30 = vld [vmem:[%s3225_s11] sm:$0xff] }
 0x10b   :  { %vm2851_vm15 = vmpackc.low %vm809_vm10, %vm808_vm11  ;;  %vm1147_vm10 = vcmp.eq.s32.totalorder %v2781_v10, %v2615_v7  ;;  %vm1146_vm11 = vcmp.eq.s32.totalorder %v2740_v59, %v2615_v7 }
 0x10c   :  { %1928 = vmatmul.msk.bf16.gmra.mxu0 %vm1927_vm0, %v2307_v15  ;;  %1978 = vmatmul.msk.bf16.gmra.mxu1 %vm2685_vm13, %v2307_v15  ;;  %vm1144_vm13 = vcmp.eq.s32.totalorder %v2748_v60, %v2615_v7  ;;  %vm563_vm0 = vcmask 523264  }
 0x10d   :  { %vm2133_vm5 = vmpackc.low %vm1145_vm2, %vm1144_vm13  ;;  %vm1149_vm13 = vcmp.eq.s32.totalorder %v2799_v14, %v2615_v7  ;;  %vm1148_vm2 = vcmp.eq.s32.totalorder %v2801_v16, %v2615_v7 }
 0x111   :  { %v2865_v36 = vpop.permute.xlu0 %1127  ;;  %v1131_v8 = vpop.permute.xlu1 %1130 }
 0x112   :  { %v2867_v38 = vpop.f32.mrf.mxu1 }
 0x119   :  { %v791_v41 = vpop.permute.xlu0 %790  ;;  %v1134_v19 = vpop.permute.xlu1 %1133 }
 0x11a   :  { %v2879_v42 = vpop.f32.mrf.mxu1  ;;  %vm811_vm4 = vcmp.eq.s32.totalorder %v791_v41, %v2615_v7 }
 0x11b   :  { %vm2883_vm8 = vmpackc.low %vm811_vm4, %vm810_vm14  ;;  %vm1151_vm14 = vcmp.eq.s32.totalorder %v2803_v17, %v2615_v7  ;;  %v2256_v17 = vld [vmem:[%s3224_s6 + $0x30] sm:$0xff] }
 0x11c   :  { %1980 = vmatmul.msk.bf16.gmra.mxu1 %vm2707_vm1, %v2307_v15  ;;  %2134 = vmatmul.msk.bf16.vlgmr.msrb.gmra.mxu0 %vm2133_vm5, %v2307_v15  ;;  %vm2135_vm1 = vmpackc.low %vm1147_vm10, %vm1146_vm11  ;;  %vm1150_vm5 = vcmp.eq.s32.totalorder %v2813_v20, %v2615_v7  ;;  %vm1153_vm11 = vcmp.eq.s32.totalorder %v2845_v31, %v2615_v7  ;;  %v1137_v20 = vpop.permute.xlu2 %1136 }
 0x11d   :  { %vm2137_vm4 = vmpackc.low %vm1149_vm13, %vm1148_vm2  ;;  %vm1155_vm2 = vcmp.eq.s32.totalorder %v1131_v8, %v2615_v7  ;;  %903 = vmatpush.bf16.msrb.mxu2 %v2256_v17 }
 0x11e   :  { %vm2139_vm10 = vmpackc.low %vm1151_vm14, %vm1150_vm5  ;;  %vm1156_vm14 = vcmp.eq.s32.totalorder %v1134_v19, %v2615_v7 }
 0x121   :  { %v2952_v28 = vpop.permute.xlu0 %793  ;;  %904 = vmatpush.bf16.msrb.mxu2 %v2255_v25 }
 0x122   :  { %v2897_v47 = vpop.f32.mrf.mxu1 }
 0x124   :  { %v1140_v41 = vpop.permute.xlu2 %1139 }
 0x125   :  { %905 = vmatpush.bf16.msrb.mxu2 %v2254_v29 }
 0x129   :  { %v1143_v37 = vpop.permute.xlu0 %1142  ;;  %906 = vmatpush.bf16.msrb.mxu2 %v2253_v39 }
 0x12a   :  { %v483_v48 = vpop.f32.mrf.mxu1 }
 0x12c   :  { %2136 = vmatmul.msk.bf16.gmra.mxu0 %vm2135_vm1, %v2307_v15  ;;  %vm1152_vm1 = vcmp.eq.s32.totalorder %v2823_v23, %v2615_v7 }
 0x12d   :  { %vm2141_vm13 = vmpackc.low %vm1153_vm11, %vm1152_vm1  ;;  %vm1159_vm1 = vcmp.eq.s32.totalorder %v1143_v37, %v2615_v7  ;;  %907 = vmatpush.bf16.msrb.mxu2 %v2252_v40 }
 0x132   :  { %v485_v45 = vpop.f32.mrf.mxu1 }
 0x133   :  { %v523_v49 = vpack.c.bf16 %v485_v45, %v483_v48  ;;  %v2251_v48 = vld [vmem:[%s3224_s6 + $0x8] sm:$0xff]  ;;  %v2250_v45 = vld [vmem:[%s3224_s6] sm:$0xff] }
 0x134   :  { %908 = vmatpush.bf16.msrb.mxu2 %v2251_v48 }
 0x135   :  { %1997 = vmatmul.msk.bf16.vlgmr.msra.gmra.mxu1 %vm563_vm0, %v523_v49 }
 0x136   :  { %1365 = vmatpush.bf16.msra.mxu1 %v2273_v18 }
 0x138   :  { %909 = vmatpush.bf16.msrb.mxu2 %v2250_v45 }
 0x139   :  { %v250_v50 = vpop.f32.mrf.mxu0 }
 0x13a   :  { %v488_v51 = vpop.f32.mrf.mxu1  ;;  %1366 = vmatpush.bf16.msra.mxu1 %v2272_v21 }
 0x13c   :  { %2138 = vmatmul.msk.bf16.gmra.mxu0 %vm2137_vm4, %v2307_v15  ;;  %vm1154_vm4 = vcmp.eq.s32.totalorder %v2865_v36, %v2615_v7 }
 0x13d   :  { %vm2143_vm5 = vmpackc.low %vm1155_vm2, %vm1154_vm4 }
 0x13e   :  { %1367 = vmatpush.bf16.msra.mxu1 %v2271_v27 }
 0x141   :  { %v252_v52 = vpop.f32.mrf.mxu0 }
 0x142   :  { %v490_v53 = vpop.f32.mrf.mxu1  ;;  %v290_v54 = vpack.c.bf16 %v252_v52, %v250_v50  ;;  %1368 = vmatpush.bf16.msra.mxu1 %v2270_v30 }
 0x143   :  { %v524_v55 = vpack.c.bf16 %v490_v53, %v488_v51 }
 0x145   :  { %1998 = vmatmul.msk.bf16.vlgmr.msra.gmra.mxu2 %vm563_vm0, %v524_v55  ;;  %2021 = vmatmul.msk.bf16.vlgmr.msrb.gmra.mxu1 %vm563_vm0, %v290_v54 }
 0x149   :  { %v255_v56 = vpop.f32.mrf.mxu0 }
 0x14a   :  { %v493_v58 = vpop.f32.mrf.mxu1 }
 0x14c   :  { %2140 = vmatmul.msk.bf16.gmra.mxu0 %vm2139_vm10, %v2307_v15  ;;  %vm1157_vm10 = vcmp.eq.s32.totalorder %v1137_v20, %v2615_v7 }
 0x14d   :  { %vm2145_vm11 = vmpackc.low %vm1157_vm10, %vm1156_vm14 }
 0x151   :  { %v257_v57 = vpop.f32.mrf.mxu0 }
 0x152   :  { %v495_v59 = vpop.f32.mrf.mxu1  ;;  %v291_v60 = vpack.c.bf16 %v257_v57, %v255_v56 }
 0x153   :  { %v525_v61 = vpack.c.bf16 %v495_v59, %v493_v58  ;;  %v296_v58 = vpack.c.bf16 %v2867_v38, %v2848_v32 }
 0x154   :  { %2022 = vmatmul.msk.bf16.vlgmr.msra.gmra.mxu3 %vm563_vm0, %v291_v60 }
 0x155   :  { %1999 = vmatmul.msk.bf16.gmra.mxu2 %vm563_vm0, %v525_v61 }
 0x159   :  { %v260_v63 = vpop.f32.mrf.mxu0 }
 0x15a   :  { %v498_v0 = vpop.f32.mrf.mxu1 }
 0x15c   :  { %2142 = vmatmul.msk.bf16.gmra.mxu0 %vm2141_vm13, %v2307_v15  ;;  %vm1158_vm13 = vcmp.eq.s32.totalorder %v1140_v41, %v2615_v7  ;;  %v2260_v41 = vld [vmem:[%s3226_s10 + $0x10] sm:$0xff] }
 0x15d   :  { %vm2147_vm2 = vmpackc.low %vm1159_vm1, %vm1158_vm13 }
 0x161   :  { %v262_v1 = vpop.f32.mrf.mxu0 }
 0x162   :  { %v500_v2 = vpop.f32.mrf.mxu1  ;;  %v292_v3 = vpack.c.bf16 %v262_v1, %v260_v63  ;;  %v297_v63 = vpack.c.bf16 %v2897_v47, %v2879_v42 }
 0x163   :  { %v526_v5 = vpack.c.bf16 %v500_v2, %v498_v0 }
 0x164   :  { %2023 = vmatmul.msk.bf16.gmra.mxu3 %vm563_vm0, %v292_v3 }
 0x165   :  { %2000 = vmatmul.msk.bf16.gmra.mxu2 %vm563_vm0, %v526_v5 }
 0x169   :  { %v265_v9 = vpop.f32.mrf.mxu0 }
 0x16a   :  { %v503_v10 = vpop.f32.mrf.mxu1 }
 0x16c   :  { %2144 = vmatmul.msk.bf16.gmra.mxu0 %vm2143_vm5, %v2307_v15 }
 0x171   :  { %v267_v12 = vpop.f32.mrf.mxu0 }
 0x172   :  { %v505_v13 = vpop.f32.mrf.mxu1  ;;  %v293_v14 = vpack.c.bf16 %v267_v12, %v265_v9 }
 0x173   :  { %v527_v16 = vpack.c.bf16 %v505_v13, %v503_v10 }
 0x174   :  { %2024 = vmatmul.msk.bf16.gmra.mxu3 %vm563_vm0, %v293_v14 }
 0x175   :  { %2001 = vmatmul.msk.bf16.gmra.mxu2 %vm563_vm0, %v527_v16 }
 0x179   :  { %v270_v23 = vpop.f32.mrf.mxu0 }
 0x17a   :  { %v508_v24 = vpop.f32.mrf.mxu1 }
 0x17c   :  { %2146 = vmatmul.msk.bf16.gmra.mxu0 %vm2145_vm11, %v2307_v15 }
 0x181   :  { %v272_v31 = vpop.f32.mrf.mxu0 }
 0x182   :  { %v510_v34 = vpop.f32.mrf.mxu1  ;;  %v294_v35 = vpack.c.bf16 %v272_v31, %v270_v23  ;;  %v2261_v23 = vld [vmem:[%s3226_s10 + $0x18] sm:$0xff] }
 0x183   :  { %v528_v36 = vpack.c.bf16 %v510_v34, %v508_v24  ;;  %1019 = vmatpush.bf16.msrb.mxu3 %v2261_v23 }
 0x184   :  { %2025 = vmatmul.msk.bf16.gmra.mxu3 %vm563_vm0, %v294_v35 }
 0x185   :  { %2002 = vmatmul.msk.bf16.gmra.mxu2 %vm563_vm0, %v528_v36 }
 0x187   :  { %1020 = vmatpush.bf16.msrb.mxu3 %v2260_v41  ;;  %v2274_v41 = vld [vmem:[%s3228_s13] sm:$0xff] }
 0x189   :  { %v275_v44 = vpop.f32.mrf.mxu0 }
 0x18a   :  { %v513_v46 = vpop.f32.mrf.mxu1 }
 0x18c   :  { %2148 = vmatmul.msk.bf16.gmra.mxu0 %vm2147_vm2, %v2307_v15 }
 0x191   :  { %v277_v49 = vpop.f32.mrf.mxu0 }
 0x192   :  { %v515_v50 = vpop.f32.mrf.mxu1  ;;  %v295_v51 = vpack.c.bf16 %v277_v49, %v275_v44  ;;  %v2259_v49 = vld [vmem:[%s3226_s10 + $0x8] sm:$0xff] }
 0x193   :  { %v529_v52 = vpack.c.bf16 %v515_v50, %v513_v46  ;;  %1021 = vmatpush.bf16.msrb.mxu3 %v2259_v49  ;;  %v797_v50 = vpop.permute.xlu1 %796 }
 0x194   :  { %2026 = vmatmul.msk.bf16.gmra.mxu3 %vm563_vm0, %v295_v51  ;;  %v2258_v51 = vld [vmem:[%s3226_s10] sm:$0xff] }
 0x195   :  { %2003 = vmatmul.msk.bf16.gmra.mxu2 %vm563_vm0, %v529_v52 }
 0x197   :  { %1022 = vmatpush.bf16.msrb.mxu3 %v2258_v51 }
 0x199   :  { %v1257_v54 = vpop.f32.mrf.mxu0 }
 0x19a   :  { %v518_v53 = vpop.f32.mrf.mxu1 }
 0x1a1   :  { %v1259_v56 = vpop.f32.mrf.mxu0 }
 0x1a2   :  { %v520_v55 = vpop.f32.mrf.mxu1  ;;  %v1297_v59 = vpack.c.bf16 %v1259_v56, %v1257_v54 }
 0x1a3   :  { %v530_v57 = vpack.c.bf16 %v520_v55, %v518_v53 }
 0x1a4   :  { %2027 = vmatmul.msk.bf16.gmra.mxu3 %vm563_vm0, %v296_v58  ;;  %2165 = vmatmul.msk.bf16.vlgmr.msra.gmra.mxu1 %vm563_vm0, %v1297_v59 }
 0x1a5   :  { %2004 = vmatmul.msk.bf16.gmra.mxu2 %vm563_vm0, %v530_v57 }
 0x1a9   :  { %v1262_v60 = vpop.f32.mrf.mxu0 }
 0x1b1   :  { %v1264_v61 = vpop.f32.mrf.mxu0 }
 0x1b2   :  { %v1298_v0 = vpack.c.bf16 %v1264_v61, %v1262_v60 }
 0x1b4   :  { %2028 = vmatmul.msk.bf16.gmra.mxu3 %vm563_vm0, %v297_v63  ;;  %2166 = vmatmul.msk.bf16.gmra.mxu1 %vm563_vm0, %v1298_v0 }
 0x1b5   :  { %2062 = vmatmul.msk.bf16.vlgmr.msrb.gmra.mxu2 %vm2752_vm9, %v2307_v15  ;;  %vm813_vm9 = vcmp.eq.s32.totalorder %v797_v50, %v2615_v7 }
 0x1b9   :  { %v1267_v32 = vpop.f32.mrf.mxu0 }
 0x1c1   :  { %v1269_v38 = vpop.f32.mrf.mxu0 }
 0x1c2   :  { %v1299_v1 = vpack.c.bf16 %v1269_v38, %v1267_v32 }
 0x1c4   :  { %2167 = vmatmul.msk.bf16.gmra.mxu1 %vm563_vm0, %v1299_v1 }
 0x1c5   :  { %2064 = vmatmul.msk.bf16.gmra.mxu2 %vm2766_vm12, %v2307_v15  ;;  %vm812_vm12 = vcmp.eq.s32.totalorder %v2952_v28, %v2615_v7 }
 0x1c8   :  { %v602_v2 = vpop.f32.mrf.mxu2 }
 0x1c9   :  { %v1272_v42 = vpop.f32.mrf.mxu0 }
 0x1d0   :  { %v2996_v47 = vpop.f32.mrf.mxu2 }
 0x1d1   :  { %v1274_v3 = vpop.f32.mrf.mxu0 }
 0x1d2   :  { %v1300_v5 = vpack.c.bf16 %v1274_v3, %v1272_v42 }
 0x1d4   :  { %2168 = vmatmul.msk.bf16.gmra.mxu1 %vm563_vm0, %v1300_v5  ;;  %v2277_v5 = vld [vmem:[%s3228_s13 + $0x18] sm:$0xff] }
 0x1d5   :  { %2066 = vmatmul.msk.bf16.gmra.mxu2 %vm2787_vm7, %v2307_v15  ;;  %vm2075_vm7 = vmpackc.low %vm813_vm9, %vm812_vm12 }
 0x1d6   :  { %1534 = vmatpush.bf16.msra.mxu2 %v2277_v5 }
 0x1d7   :  { %v699_v6 = vpop.f32.mrf.mxu3 }
 0x1d8   :  { %v607_v62 = vpop.f32.mrf.mxu2  ;;  %v3002_v8 = vadd.f32 %v699_v6, %v602_v2 }
 0x1d9   :  { %v1277_v4 = vpop.f32.mrf.mxu0 }
 0x1df   :  { %v3006_v10 = vpop.f32.mrf.mxu3 }
 0x1e0   :  { %v3004_v9 = vpop.f32.mrf.mxu2 }
 0x1e1   :  { %v1279_v12 = vpop.f32.mrf.mxu0 }
 0x1e2   :  { %v1301_v13 = vpack.c.bf16 %v1279_v12, %v1277_v4  ;;  %v597_v4 = vpop.f32.mrf.mxu1 }
 0x1e4   :  { %2169 = vmatmul.msk.bf16.gmra.mxu1 %vm563_vm0, %v1301_v13 }
 0x1e5   :  { %2068 = vmatmul.msk.bf16.gmra.mxu2 %vm2819_vm3, %v2307_v15  ;;  %vm1623_vm3 = vcmask 261120  }
 0x1e7   :  { %v704_v14 = vpop.f32.mrf.mxu3 }
 0x1e8   :  { %v612_v11 = vpop.f32.mrf.mxu2  ;;  %v3012_v16 = vadd.f32 %v704_v14, %v607_v62 }
 0x1e9   :  { %v1282_v17 = vpop.f32.mrf.mxu0 }
 0x1ea   :  { %v599_v13 = vpop.f32.mrf.mxu1 }
 0x1ef   :  { %v3016_v19 = vpop.f32.mrf.mxu3 }
 0x1f0   :  { %v3014_v18 = vpop.f32.mrf.mxu2 }
 0x1f1   :  { %v1284_v20 = vpop.f32.mrf.mxu0 }
 0x1f2   :  { %v1302_v21 = vpack.c.bf16 %v1284_v20, %v1282_v17  ;;  %v2276_v17 = vld [vmem:[%s3228_s13 + $0x10] sm:$0xff]  ;;  %v694_v20 = vpop.f32.mrf.mxu1 }
 0x1f3   :  { %1535 = vmatpush.bf16.msra.mxu2 %v2276_v17 }
 0x1f4   :  { %2170 = vmatmul.msk.bf16.gmra.mxu1 %vm563_vm0, %v1302_v21 }
 0x1f5   :  { %2070 = vmatmul.msk.bf16.gmra.mxu2 %vm2831_vm6, %v2307_v15  ;;  %vm1733_vm6 = vcmask 130048  }
 0x1f7   :  { %v709_v24 = vpop.f32.mrf.mxu3 }
 0x1f8   :  { %v617_v22 = vpop.f32.mrf.mxu2  ;;  %v3025_v25 = vadd.f32 %v709_v24, %v612_v11 }
 0x1f9   :  { %v1287_v27 = vpop.f32.mrf.mxu0 }
 0x1fa   :  { %v696_v24 = vpop.f32.mrf.mxu1 }
 0x1fb   :  { %v697_v51 = vadd.f32 %v696_v24, %v599_v13 }
 0x1ff   :  { %v3029_v30 = vpop.f32.mrf.mxu3 }
 0x200   :  { %v3027_v29 = vpop.f32.mrf.mxu2 }
 0x201   :  { %v1289_v31 = vpop.f32.mrf.mxu0 }
 0x202   :  { %v1303_v34 = vpack.c.bf16 %v1289_v31, %v1287_v27 }
 0x204   :  { %2171 = vmatmul.msk.bf16.gmra.mxu1 %vm563_vm0, %v1303_v34 }
 0x205   :  { %2072 = vmatmul.msk.bf16.gmra.mxu2 %vm2851_vm15, %v2307_v15  ;;  %vm1839_vm15 = vcmask 64512  }
 0x207   :  { %v714_v35 = vpop.f32.mrf.mxu3 }
 0x208   :  { %v622_v26 = vpop.f32.mrf.mxu2  ;;  %v3035_v36 = vadd.f32 %v714_v35, %v617_v22  ;;  %v2275_v35 = vld [vmem:[%s3228_s13 + $0x8] sm:$0xff] }
 0x209   :  { %v1292_v39 = vpop.f32.mrf.mxu0  ;;  %1536 = vmatpush.bf16.msra.mxu2 %v2275_v35 }
 0x20d   :  { %1537 = vmatpush.bf16.msra.mxu2 %v2274_v41 }
 0x20f   :  { %v3039_v40 = vpop.f32.mrf.mxu3 }
 0x210   :  { %v3037_v37 = vpop.f32.mrf.mxu2 }
 0x211   :  { %v1294_v44 = vpop.f32.mrf.mxu0 }
 0x212   :  { %v1304_v46 = vpack.c.bf16 %v1294_v44, %v1292_v39 }
 0x214   :  { %2172 = vmatmul.msk.bf16.gmra.mxu1 %vm563_vm0, %v1304_v46 }
 0x215   :  { %2074 = vmatmul.msk.bf16.gmra.mxu2 %vm2883_vm8, %v2307_v15 }
 0x217   :  { %v719_v48 = vpop.f32.mrf.mxu3 }
 0x218   :  { %v627_v33 = vpop.f32.mrf.mxu2  ;;  %v3048_v45 = vadd.f32 %v719_v48, %v622_v26  ;;  %v695_v48 = vadd.f32 %v694_v20, %v597_v4 }
 0x21f   :  { %v3058_v43 = vpop.f32.mrf.mxu3 }
 0x220   :  { %v3056_v52 = vpop.f32.mrf.mxu2 }
 0x221   :  { %v1370_v31 = vpop.f32.mrf.mxu1 }
 0x225   :  { %2076 = vmatmul.msk.bf16.gmra.mxu2 %vm2075_vm7, %v2307_v15 }
 0x227   :  { %v724_v54 = vpop.f32.mrf.mxu3 }
 0x228   :  { %v632_v53 = vpop.f32.mrf.mxu2  ;;  %v3064_v55 = vadd.f32 %v724_v54, %v627_v33  ;;  %v3097_v54 = vld [vmem:[%s3227_s12] ss:$0 sm:$0xff] }
 0x229   :  { %v1372_v39 = vpop.f32.mrf.mxu1 }
 0x22f   :  { %v3068_v58 = vpop.f32.mrf.mxu3 }
 0x230   :  { %v3066_v56 = vpop.f32.mrf.mxu2 }
 0x231   :  { %v1375_v44 = vpop.f32.mrf.mxu1 }
 0x237   :  { %v729_v57 = vpop.f32.mrf.mxu3 }
 0x238   :  { %v911_v59 = vpop.f32.mrf.mxu2  ;;  %v3070_v60 = vadd.f32 %v729_v57, %v632_v53 }
 0x239   :  { %v1377_v49 = vpop.f32.mrf.mxu1 }
 0x23f   :  { %v3092_v46 = vpop.f32.mrf.mxu3 }
 0x240   :  { %v913_v61 = vpop.f32.mrf.mxu2 }
 0x241   :  { %v951_v63 = vpack.c.bf16 %v913_v61, %v911_v59 }
 0x243   :  { %2093 = vmatmul.msk.bf16.vlgmr.msrb.gmra.mxu3 %vm563_vm0, %v951_v63 }
 0x248   :  { %v916_v7 = vpop.f32.mrf.mxu2 }
 0x250   :  { %v918_v28 = vpop.f32.mrf.mxu2 }
 0x251   :  { %v952_v0 = vpack.c.bf16 %v918_v28, %v916_v7  ;;  %v1380_v7 = vpop.f32.mrf.mxu1 }
 0x253   :  { %2094 = vmatmul.msk.bf16.gmra.mxu3 %vm563_vm0, %v952_v0 }
 0x258   :  { %v921_v15 = vpop.f32.mrf.mxu2 }
 0x260   :  { %v923_v32 = vpop.f32.mrf.mxu2 }
 0x261   :  { %v953_v38 = vpack.c.bf16 %v923_v32, %v921_v15 }
 0x263   :  { %2095 = vmatmul.msk.bf16.gmra.mxu3 %vm563_vm0, %v953_v38 }
 0x268   :  { %v926_v1 = vpop.f32.mrf.mxu2 }
 0x270   :  { %v928_v2 = vpop.f32.mrf.mxu2 }
 0x271   :  { %v954_v42 = vpack.c.bf16 %v928_v2, %v926_v1  ;;  %v1382_v2 = vpop.f32.mrf.mxu1 }
 0x273   :  { %2096 = vmatmul.msk.bf16.gmra.mxu3 %vm563_vm0, %v954_v42  ;;  %v702_v42 = vadd.f32 %v3006_v10, %v2996_v47  ;;  %v707_v47 = vadd.f32 %v3016_v19, %v3004_v9  ;;  %v712_v9 = vadd.f32 %v3029_v30, %v3014_v18  ;;  %v717_v18 = vadd.f32 %v3039_v40, %v3027_v29 }
 0x274   :  { %v722_v40 = vadd.f32 %v3058_v43, %v3037_v37  ;;  %v727_v37 = vadd.f32 %v3068_v58, %v3056_v52  ;;  %v732_v52 = vadd.f32 %v3092_v46, %v3066_v56  ;;  %v3153_v46 = vld [vmem:[%s3229_s14] ss:$0 sm:$0xff] }
 0x278   :  { %v931_v3 = vpop.f32.mrf.mxu2 }
 0x280   :  { %v933_v62 = vpop.f32.mrf.mxu2 }
 0x281   :  { %v955_v6 = vpack.c.bf16 %v933_v62, %v931_v3 }
 0x283   :  { %2097 = vmatmul.msk.bf16.gmra.mxu3 %vm563_vm0, %v955_v6 }
 0x288   :  { %v936_v12 = vpop.f32.mrf.mxu2 }
 0x290   :  { %v938_v11 = vpop.f32.mrf.mxu2 }
 0x291   :  { %v956_v14 = vpack.c.bf16 %v938_v11, %v936_v12 }
 0x293   :  { %2098 = vmatmul.msk.bf16.gmra.mxu3 %vm563_vm0, %v956_v14  ;;  %v1385_v14 = vpop.f32.mrf.mxu1 }
 0x298   :  { %v941_v21 = vpop.f32.mrf.mxu2 }
 0x2a0   :  { %v943_v23 = vpop.f32.mrf.mxu2 }
 0x2a1   :  { %v957_v22 = vpack.c.bf16 %v943_v23, %v941_v21 }
 0x2a3   :  { %2099 = vmatmul.msk.bf16.gmra.mxu3 %vm563_vm0, %v957_v22  ;;  %v1387_v22 = vpop.f32.mrf.mxu1 }
 0x2a8   :  { %v946_v27 = vpop.f32.mrf.mxu2 }
 0x2ab   :  { %v1390_v41 = vpop.f32.mrf.mxu1 }
 0x2b0   :  { %v948_v34 = vpop.f32.mrf.mxu2 }
 0x2b1   :  { %v958_v26 = vpack.c.bf16 %v948_v34, %v946_v27 }
 0x2b3   :  { %2100 = vmatmul.msk.bf16.gmra.mxu3 %vm563_vm0, %v958_v26 }
 0x2c6   :  { %v1024_v33 = vpop.f32.mrf.mxu3 }
 0x2c7   :  { %v1064_v50 = vadd.f32 %v1024_v33, %v695_v48 }
 0x2c9   :  { %v1410_v53 = vadd.f32 %v1370_v31, %v1064_v50 }
 0x2cb   :  { %v1430_v61 = vadd.f32 %v3097_v54, %v1410_v53 }
 0x2cd   :  { %v1446_v0 = vmax.f32 %v1430_v61, 0.0 }
 0x2ce   :  { %v1026_v57 = vpop.f32.mrf.mxu3 }
 0x2cf   :  { %v1065_v59 = vadd.f32 %v1026_v57, %v697_v51  ;;  %v1392_v51 = vpop.f32.mrf.mxu1 }
 0x2d1   :  { %v1411_v63 = vadd.f32 %v1372_v39, %v1065_v59 }
 0x2d3   :  { %v1431_v28 = vadd.f32 %v3097_v54, %v1411_v63  ;;  %v2279_v63 = vld [vmem:[%s3230_s15 + $0x8] sm:$0xff] }
 0x2d4   :  { %1654 = vmatpush.bf16.msra.mxu3 %v2279_v63 }
 0x2d5   :  { %v1447_v15 = vmax.f32 %v1431_v28, 0.0 }
 0x2d6   :  { %v1029_v32 = vpop.f32.mrf.mxu3 }
 0x2d7   :  { %v1462_v38 = vpack.c.bf16 %v1447_v15, %v1446_v0  ;;  %v1066_v1 = vadd.f32 %v1029_v32, %v3002_v8 }
 0x2d9   :  { %2189 = vmatmul.msk.bf16.vlgmr.msra.gmra.mxu2 %vm563_vm0, %v1462_v38  ;;  %v1412_v3 = vadd.f32 %v1375_v44, %v1066_v1 }
 0x2db   :  { %v1432_v6 = vadd.f32 %v3097_v54, %v1412_v3 }
 0x2dd   :  { %v1448_v13 = vmax.f32 %v1432_v6, 0.0 }
 0x2de   :  { %v1031_v5 = vpop.f32.mrf.mxu3 }
 0x2df   :  { %v1067_v62 = vadd.f32 %v1031_v5, %v702_v42 }
 0x2e1   :  { %v1413_v4 = vadd.f32 %v1377_v49, %v1067_v62 }
 0x2e3   :  { %v1433_v12 = vadd.f32 %v3097_v54, %v1413_v4 }
 0x2e5   :  { %v1449_v11 = vmax.f32 %v1433_v12, 0.0 }
 0x2e6   :  { %v1034_v17 = vpop.f32.mrf.mxu3 }
 0x2e7   :  { %v1463_v20 = vpack.c.bf16 %v1449_v11, %v1448_v13  ;;  %v1068_v8 = vadd.f32 %v1034_v17, %v3012_v16 }
 0x2e9   :  { %2190 = vmatmul.msk.bf16.gmra.mxu2 %vm563_vm0, %v1463_v20  ;;  %v1414_v10 = vadd.f32 %v1380_v7, %v1068_v8  ;;  %v1395_v7 = vpop.f32.mrf.mxu1 }
 0x2eb   :  { %v1434_v24 = vadd.f32 %v3097_v54, %v1414_v10 }
 0x2ed   :  { %v1450_v34 = vmax.f32 %v1434_v24, 0.0 }
 0x2ee   :  { %v1036_v21 = vpop.f32.mrf.mxu3 }
 0x2ef   :  { %v1069_v23 = vadd.f32 %v1036_v21, %v707_v47 }
 0x2f1   :  { %v1415_v27 = vadd.f32 %v1382_v2, %v1069_v23  ;;  %v1397_v3 = vpop.f32.mrf.mxu1 }
 0x2f3   :  { %v1435_v31 = vadd.f32 %v3097_v54, %v1415_v27 }
 0x2f5   :  { %v1451_v26 = vmax.f32 %v1435_v31, 0.0 }
 0x2f6   :  { %v1039_v35 = vpop.f32.mrf.mxu3 }
 0x2f7   :  { %v1464_v39 = vpack.c.bf16 %v1451_v26, %v1450_v34  ;;  %v1070_v16 = vadd.f32 %v1039_v35, %v3025_v25 }
 0x2f9   :  { %2191 = vmatmul.msk.bf16.gmra.mxu2 %vm563_vm0, %v1464_v39  ;;  %v1416_v19 = vadd.f32 %v1385_v14, %v1070_v16  ;;  %v1400_v13 = vpop.f32.mrf.mxu1 }
 0x2fb   :  { %v1436_v48 = vadd.f32 %v3097_v54, %v1416_v19 }
 0x2fd   :  { %v1452_v53 = vmax.f32 %v1436_v48, 0.0 }
 0x2fe   :  { %v1041_v44 = vpop.f32.mrf.mxu3 }
 0x2ff   :  { %v1071_v33 = vadd.f32 %v1041_v44, %v712_v9 }
 0x301   :  { %v1417_v49 = vadd.f32 %v1387_v22, %v1071_v33  ;;  %v1402_v47 = vpop.f32.mrf.mxu1 }
 0x303   :  { %v1437_v50 = vadd.f32 %v3097_v54, %v1417_v49 }
 0x305   :  { %v1453_v57 = vmax.f32 %v1437_v50, 0.0 }
 0x306   :  { %v1044_v59 = vpop.f32.mrf.mxu3 }
 0x307   :  { %v1465_v61 = vpack.c.bf16 %v1453_v57, %v1452_v53  ;;  %v1072_v25 = vadd.f32 %v1044_v59, %v3035_v36 }
 0x309   :  { %2192 = vmatmul.msk.bf16.gmra.mxu2 %vm563_vm0, %v1465_v61  ;;  %v1418_v30 = vadd.f32 %v1390_v41, %v1072_v25  ;;  %v1405_v34 = vpop.f32.mrf.mxu1 }
 0x30b   :  { %v1438_v15 = vadd.f32 %v3097_v54, %v1418_v30 }
 0x30d   :  { %v1454_v36 = vmax.f32 %v1438_v15, 0.0 }
 0x30e   :  { %v1046_v28 = vpop.f32.mrf.mxu3 }
 0x30f   :  { %v1073_v0 = vadd.f32 %v1046_v28, %v717_v18 }
 0x311   :  { %v1419_v32 = vadd.f32 %v1392_v51, %v1073_v0  ;;  %v1407_v41 = vpop.f32.mrf.mxu1 }
 0x313   :  { %v1439_v38 = vadd.f32 %v3097_v54, %v1419_v32 }
 0x315   :  { %v1455_v1 = vmax.f32 %v1439_v38, 0.0 }
 0x316   :  { %v1049_v2 = vpop.f32.mrf.mxu3 }
 0x317   :  { %v1466_v42 = vpack.c.bf16 %v1455_v1, %v1454_v36  ;;  %v1074_v29 = vadd.f32 %v1049_v2, %v3048_v45 }
 0x319   :  { %2193 = vmatmul.msk.bf16.gmra.mxu2 %vm563_vm0, %v1466_v42  ;;  %v1420_v5 = vadd.f32 %v1395_v7, %v1074_v29 }
 0x31b   :  { %v1440_v4 = vadd.f32 %v3097_v54, %v1420_v5 }
 0x31d   :  { %v1456_v14 = vmax.f32 %v1440_v4, 0.0 }
 0x31e   :  { %v1051_v62 = vpop.f32.mrf.mxu3 }
 0x31f   :  { %v1075_v6 = vadd.f32 %v1051_v62, %v722_v40 }
 0x321   :  { %v1421_v12 = vadd.f32 %v1397_v3, %v1075_v6 }
 0x323   :  { %v1441_v11 = vadd.f32 %v3097_v54, %v1421_v12  ;;  %v2280_v12 = vld [vmem:[%s3232_s17] sm:$0xff] }
 0x324   :  { %1765 = vmatpush.bf16.msra.mxu0 %v2280_v12 }
 0x325   :  { %v1457_v17 = vmax.f32 %v1441_v11, 0.0 }
 0x326   :  { %v1054_v20 = vpop.f32.mrf.mxu3 }
 0x327   :  { %v1467_v8 = vpack.c.bf16 %v1457_v17, %v1456_v14  ;;  %v1076_v45 = vadd.f32 %v1054_v20, %v3064_v55 }
 0x329   :  { %2194 = vmatmul.msk.bf16.gmra.mxu2 %vm563_vm0, %v1467_v8  ;;  %v1422_v43 = vadd.f32 %v1400_v13, %v1076_v45 }
 0x32b   :  { %v1442_v23 = vadd.f32 %v3097_v54, %v1422_v43 }
 0x32d   :  { %v1458_v27 = vmax.f32 %v1442_v23, 0.0 }
 0x32e   :  { %v1056_v10 = vpop.f32.mrf.mxu3 }
 0x32f   :  { %v1077_v21 = vadd.f32 %v1056_v10, %v727_v37 }
 0x331   :  { %v1423_v22 = vadd.f32 %v1402_v47, %v1077_v21 }
 0x333   :  { %v1443_v24 = vadd.f32 %v3097_v54, %v1423_v22 }
 0x335   :  { %v1459_v31 = vmax.f32 %v1443_v24, 0.0 }
 0x336   :  { %v1059_v26 = vpop.f32.mrf.mxu3 }
 0x337   :  { %v1468_v35 = vpack.c.bf16 %v1459_v31, %v1458_v27  ;;  %v1078_v55 = vadd.f32 %v1059_v26, %v3070_v60  ;;  %v2278_v60 = vld [vmem:[%s3230_s15] sm:$0xff] }
 0x338   :  { %1655 = vmatpush.bf16.msra.mxu3 %v2278_v60 }
 0x339   :  { %2195 = vmatmul.msk.bf16.gmra.mxu2 %vm563_vm0, %v1468_v35  ;;  %v1424_v58 = vadd.f32 %v1405_v34, %v1078_v55 }
 0x33b   :  { %v1444_v9 = vadd.f32 %v3097_v54, %v1424_v58 }
 0x33d   :  { %v1460_v33 = vmax.f32 %v1444_v9, 0.0 }
 0x33e   :  { %v1061_v39 = vpop.f32.mrf.mxu3 }
 0x33f   :  { %v1079_v16 = vadd.f32 %v1061_v39, %v732_v52 }
 0x341   :  { %v1425_v19 = vadd.f32 %v1407_v41, %v1079_v16 }
 0x343   :  { %v1445_v44 = vadd.f32 %v3097_v54, %v1425_v19 }
 0x345   :  { %v1461_v48 = vmax.f32 %v1445_v44, 0.0  ;;  %v2304_v44 = vld [vmem:[%s3231_s16] ss:$0 sm:$0xff] }
 0x347   :  { %v1469_v49 = vpack.c.bf16 %v1461_v48, %v1460_v33 }
 0x349   :  { %2196 = vmatmul.msk.bf16.gmra.mxu2 %vm563_vm0, %v1469_v49 }
 0x35c   :  { %v1539_v56 = vpop.f32.mrf.mxu2 }
 0x35d   :  { %v1540_v50 = vadd.f32 %v3153_v46, %v1539_v56 }
 0x35f   :  { %v1579_v53 = vmax.f32 %v1540_v50, 0.0 }
 0x364   :  { %v1541_v51 = vpop.f32.mrf.mxu2 }
 0x365   :  { %v1542_v54 = vadd.f32 %v3153_v46, %v1541_v51 }
 0x367   :  { %v1580_v57 = vmax.f32 %v1542_v54, 0.0 }
 0x369   :  { %v1595_v59 = vpack.c.bf16 %v1580_v57, %v1579_v53 }
 0x36b   :  { %2205 = vmatmul.msk.bf16.vlgmr.msra.gmra.mxu3 %vm1623_vm3, %v1595_v59 }
 0x36c   :  { %v1544_v61 = vpop.f32.mrf.mxu2 }
 0x36d   :  { %v1545_v25 = vadd.f32 %v3153_v46, %v1544_v61 }
 0x36f   :  { %v1581_v63 = vmax.f32 %v1545_v25, 0.0 }
 0x374   :  { %v1546_v18 = vpop.f32.mrf.mxu2 }
 0x375   :  { %v1547_v30 = vadd.f32 %v3153_v46, %v1546_v18 }
 0x377   :  { %v1582_v7 = vmax.f32 %v1547_v30, 0.0 }
 0x379   :  { %v1596_v28 = vpack.c.bf16 %v1582_v7, %v1581_v63 }
 0x37b   :  { %2206 = vmatmul.msk.bf16.gmra.mxu3 %vm1623_vm3, %v1596_v28 }
 0x37c   :  { %v1549_v0 = vpop.f32.mrf.mxu2 }
 0x37d   :  { %v1550_v15 = vadd.f32 %v3153_v46, %v1549_v0 }
 0x37f   :  { %v1583_v36 = vmax.f32 %v1550_v15, 0.0 }
 0x384   :  { %v1551_v32 = vpop.f32.mrf.mxu2 }
 0x385   :  { %v1552_v38 = vadd.f32 %v3153_v46, %v1551_v32 }
 0x387   :  { %v1584_v1 = vmax.f32 %v1552_v38, 0.0 }
 0x389   :  { %v1597_v2 = vpack.c.bf16 %v1584_v1, %v1583_v36 }
 0x38b   :  { %2207 = vmatmul.msk.bf16.gmra.mxu3 %vm1623_vm3, %v1597_v2 }
 0x38c   :  { %v1554_v42 = vpop.f32.mrf.mxu2 }
 0x38d   :  { %v1555_v3 = vadd.f32 %v3153_v46, %v1554_v42 }
 0x38f   :  { %v1585_v5 = vmax.f32 %v1555_v3, 0.0 }
 0x394   :  { %v1556_v29 = vpop.f32.mrf.mxu2 }
 0x395   :  { %v1557_v40 = vadd.f32 %v3153_v46, %v1556_v29 }
 0x397   :  { %v1586_v62 = vmax.f32 %v1557_v40, 0.0 }
 0x399   :  { %v1598_v6 = vpack.c.bf16 %v1586_v62, %v1585_v5 }
 0x39b   :  { %2208 = vmatmul.msk.bf16.gmra.mxu3 %vm1623_vm3, %v1598_v6 }
 0x39c   :  { %v1559_v4 = vpop.f32.mrf.mxu2 }
 0x39d   :  { %v1560_v13 = vadd.f32 %v3153_v46, %v1559_v4 }
 0x39f   :  { %v1587_v17 = vmax.f32 %v1560_v13, 0.0 }
 0x3a4   :  { %v1561_v11 = vpop.f32.mrf.mxu2 }
 0x3a5   :  { %v1562_v14 = vadd.f32 %v3153_v46, %v1561_v11 }
 0x3a7   :  { %v1588_v20 = vmax.f32 %v1562_v14, 0.0 }
 0x3a9   :  { %v1599_v8 = vpack.c.bf16 %v1588_v20, %v1587_v17 }
 0x3ab   :  { %2209 = vmatmul.msk.bf16.gmra.mxu3 %vm1623_vm3, %v1599_v8 }
 0x3ac   :  { %v1564_v45 = vpop.f32.mrf.mxu2 }
 0x3ad   :  { %v1565_v47 = vadd.f32 %v3153_v46, %v1564_v45 }
 0x3af   :  { %v1589_v10 = vmax.f32 %v1565_v47, 0.0 }
 0x3b4   :  { %v1566_v37 = vpop.f32.mrf.mxu2 }
 0x3b5   :  { %v1567_v43 = vadd.f32 %v3153_v46, %v1566_v37 }
 0x3b7   :  { %v1590_v21 = vmax.f32 %v1567_v43, 0.0 }
 0x3b9   :  { %v1600_v23 = vpack.c.bf16 %v1590_v21, %v1589_v10 }
 0x3bb   :  { %2210 = vmatmul.msk.bf16.gmra.mxu3 %vm1623_vm3, %v1600_v23 }
 0x3bc   :  { %v1569_v22 = vpop.f32.mrf.mxu2 }
 0x3bd   :  { %v1570_v24 = vadd.f32 %v3153_v46, %v1569_v22 }
 0x3bf   :  { %v1591_v34 = vmax.f32 %v1570_v24, 0.0 }
 0x3c4   :  { %v1571_v27 = vpop.f32.mrf.mxu2 }
 0x3c5   :  { %v1572_v31 = vadd.f32 %v3153_v46, %v1571_v27 }
 0x3c7   :  { %v1592_v26 = vmax.f32 %v1572_v31, 0.0 }
 0x3c9   :  { %v1601_v35 = vpack.c.bf16 %v1592_v26, %v1591_v34 }
 0x3cb   :  { %2211 = vmatmul.msk.bf16.gmra.mxu3 %vm1623_vm3, %v1601_v35 }
 0x3cc   :  { %v1574_v55 = vpop.f32.mrf.mxu2 }
 0x3cd   :  { %v1575_v52 = vadd.f32 %v3153_v46, %v1574_v55 }
 0x3cf   :  { %v1593_v16 = vmax.f32 %v1575_v52, 0.0  ;;  %v2305_v52 = vld [vmem:[%s3233_s18] ss:$0 sm:$0xff] }
 0x3d4   :  { %v1576_v58 = vpop.f32.mrf.mxu2 }
 0x3d5   :  { %v1577_v39 = vadd.f32 %v3153_v46, %v1576_v58 }
 0x3d7   :  { %v1594_v41 = vmax.f32 %v1577_v39, 0.0 }
 0x3d9   :  { %v1602_v9 = vpack.c.bf16 %v1594_v41, %v1593_v16 }
 0x3db   :  { %2212 = vmatmul.msk.bf16.gmra.mxu3 %vm1623_vm3, %v1602_v9 }
 0x3ee   :  { %v1657_v19 = vpop.f32.mrf.mxu3 }
 0x3ef   :  { %v1658_v33 = vadd.f32 %v2304_v44, %v1657_v19 }
 0x3f1   :  { %v1697_v60 = vmax.f32 %v1658_v33, 0.0 }
 0x3f6   :  { %v1659_v48 = vpop.f32.mrf.mxu3 }
 0x3f7   :  { %v1660_v49 = vadd.f32 %v2304_v44, %v1659_v48 }
 0x3f9   :  { %v1698_v56 = vmax.f32 %v1660_v49, 0.0 }
 0x3fb   :  { %v1713_v50 = vpack.c.bf16 %v1698_v56, %v1697_v60 }
 0x3fd   :  { %2217 = vmatmul.msk.bf16.vlgmr.msra.gmra.mxu0 %vm1733_vm6, %v1713_v50 }
 0x3fe   :  { %v1662_v46 = vpop.f32.mrf.mxu3 }
 0x3ff   :  { %v1663_v51 = vadd.f32 %v2304_v44, %v1662_v46 }
 0x401   :  { %v1699_v57 = vmax.f32 %v1663_v51, 0.0 }
 0x406   :  { %v1664_v54 = vpop.f32.mrf.mxu3 }
 0x407   :  { %v1665_v53 = vadd.f32 %v2304_v44, %v1664_v54 }
 0x409   :  { %v1700_v59 = vmax.f32 %v1665_v53, 0.0 }
 0x40b   :  { %v1714_v61 = vpack.c.bf16 %v1700_v59, %v1699_v57 }
 0x40d   :  { %2218 = vmatmul.msk.bf16.gmra.mxu0 %vm1733_vm6, %v1714_v61 }
 0x40e   :  { %v1667_v25 = vpop.f32.mrf.mxu3 }
 0x40f   :  { %v1668_v18 = vadd.f32 %v2304_v44, %v1667_v25 }
 0x411   :  { %v1701_v7 = vmax.f32 %v1668_v18, 0.0 }
 0x416   :  { %v1669_v30 = vpop.f32.mrf.mxu3 }
 0x417   :  { %v1670_v63 = vadd.f32 %v2304_v44, %v1669_v30 }
 0x419   :  { %v1702_v28 = vmax.f32 %v1670_v63, 0.0 }
 0x41b   :  { %v1715_v0 = vpack.c.bf16 %v1702_v28, %v1701_v7 }
 0x41d   :  { %2219 = vmatmul.msk.bf16.gmra.mxu0 %vm1733_vm6, %v1715_v0 }
 0x41e   :  { %v1672_v15 = vpop.f32.mrf.mxu3 }
 0x41f   :  { %v1673_v32 = vadd.f32 %v2304_v44, %v1672_v15 }
 0x421   :  { %v1703_v1 = vmax.f32 %v1673_v32, 0.0 }
 0x426   :  { %v1674_v38 = vpop.f32.mrf.mxu3 }
 0x427   :  { %v1675_v36 = vadd.f32 %v2304_v44, %v1674_v38 }
 0x429   :  { %v1704_v2 = vmax.f32 %v1675_v36, 0.0 }
 0x42b   :  { %v1716_v42 = vpack.c.bf16 %v1704_v2, %v1703_v1 }
 0x42d   :  { %2220 = vmatmul.msk.bf16.gmra.mxu0 %vm1733_vm6, %v1716_v42 }
 0x42e   :  { %v1677_v3 = vpop.f32.mrf.mxu3 }
 0x42f   :  { %v1678_v29 = vadd.f32 %v2304_v44, %v1677_v3 }
 0x431   :  { %v1705_v62 = vmax.f32 %v1678_v29, 0.0 }
 0x436   :  { %v1679_v40 = vpop.f32.mrf.mxu3 }
 0x437   :  { %v1680_v5 = vadd.f32 %v2304_v44, %v1679_v40 }
 0x439   :  { %v1706_v6 = vmax.f32 %v1680_v5, 0.0 }
 0x43b   :  { %v1717_v4 = vpack.c.bf16 %v1706_v6, %v1705_v62 }
 0x43d   :  { %2221 = vmatmul.msk.bf16.gmra.mxu0 %vm1733_vm6, %v1717_v4 }
 0x43e   :  { %v1682_v12 = vpop.f32.mrf.mxu3 }
 0x43f   :  { %v1683_v13 = vadd.f32 %v2304_v44, %v1682_v12 }
 0x441   :  { %v1707_v17 = vmax.f32 %v1683_v13, 0.0 }
 0x446   :  { %v1684_v11 = vpop.f32.mrf.mxu3 }
 0x447   :  { %v1685_v14 = vadd.f32 %v2304_v44, %v1684_v11 }
 0x449   :  { %v1708_v20 = vmax.f32 %v1685_v14, 0.0 }
 0x44b   :  { %v1718_v8 = vpack.c.bf16 %v1708_v20, %v1707_v17 }
 0x44d   :  { %2222 = vmatmul.msk.bf16.gmra.mxu0 %vm1733_vm6, %v1718_v8 }
 0x44e   :  { %v1687_v45 = vpop.f32.mrf.mxu3 }
 0x44f   :  { %v1688_v47 = vadd.f32 %v2304_v44, %v1687_v45 }
 0x451   :  { %v1709_v10 = vmax.f32 %v1688_v47, 0.0 }
 0x456   :  { %v1689_v37 = vpop.f32.mrf.mxu3 }
 0x457   :  { %v1690_v43 = vadd.f32 %v2304_v44, %v1689_v37 }
 0x459   :  { %v1710_v21 = vmax.f32 %v1690_v43, 0.0 }
 0x45b   :  { %v1719_v23 = vpack.c.bf16 %v1710_v21, %v1709_v10 }
 0x45d   :  { %2223 = vmatmul.msk.bf16.gmra.mxu0 %vm1733_vm6, %v1719_v23 }
 0x45e   :  { %v1692_v22 = vpop.f32.mrf.mxu3 }
 0x45f   :  { %v1693_v24 = vadd.f32 %v2304_v44, %v1692_v22 }
 0x461   :  { %v1711_v34 = vmax.f32 %v1693_v24, 0.0 }
 0x466   :  { %v1694_v27 = vpop.f32.mrf.mxu3 }
 0x467   :  { %v1695_v31 = vadd.f32 %v2304_v44, %v1694_v27 }
 0x469   :  { %v1712_v26 = vmax.f32 %v1695_v31, 0.0 }
 0x46b   :  { %v1720_v35 = vpack.c.bf16 %v1712_v26, %v1711_v34 }
 0x46d   :  { %2224 = vmatmul.msk.bf16.gmra.mxu0 %vm1733_vm6, %v1720_v35 }
 0x47a   :  { %v1767_v55 = vpop.f32.mrf.mxu0 }
 0x47b   :  { %v1768_v58 = vadd.f32 %v2305_v52, %v1767_v55 }
 0x47d   :  { %v1807_v41 = vmax.f32 %v1768_v58, 0.0  ;;  %v1836_v58 = vpop.permute.xlu1 %1835 }
 0x482   :  { %v1769_v39 = vpop.f32.mrf.mxu0 }
 0x483   :  { %v1770_v16 = vadd.f32 %v2305_v52, %v1769_v39  ;;  %v1838_v39 = vperm.slane %v1836_v58, 0 }
 0x485   :  { %v1808_v9 = vmax.f32 %v1770_v16, 0.0 }
 0x487   :  { %v3196_v19 = vpack.c.bf16 %v1808_v9, %v1807_v41 }
 0x489   :  { %v1844_v55 = vsel %vm1839_vm15, %v3196_v19, 0 }
 0x48a   :  { %v1772_v33 = vpop.f32.mrf.mxu0 }
 0x48b   :  { %v1773_v48 = vadd.f32 %v2305_v52, %v1772_v33 }
 0x48d   :  { %v1809_v60 = vmax.f32 %v1773_v48, 0.0 }
 0x492   :  { %v1774_v44 = vpop.f32.mrf.mxu0 }
 0x493   :  { %v1775_v49 = vadd.f32 %v2305_v52, %v1774_v44 }
 0x495   :  { %v1810_v56 = vmax.f32 %v1775_v49, 0.0 }
 0x497   :  { %v1825_v50 = vpack.c.bf16 %v1810_v56, %v1809_v60 }
 0x499   :  { %v1847_v35 = vsel %vm1839_vm15, %v1825_v50, 0 }
 0x49a   :  { %v1777_v46 = vpop.f32.mrf.mxu0 }
 0x49b   :  { %v1778_v51 = vadd.f32 %v2305_v52, %v1777_v46 }
 0x49d   :  { %v1811_v57 = vmax.f32 %v1778_v51, 0.0 }
 0x4a2   :  { %v1779_v54 = vpop.f32.mrf.mxu0 }
 0x4a3   :  { %v1780_v53 = vadd.f32 %v2305_v52, %v1779_v54 }
 0x4a5   :  { %v1812_v59 = vmax.f32 %v1780_v53, 0.0 }
 0x4a7   :  { %v1826_v61 = vpack.c.bf16 %v1812_v59, %v1811_v57 }
 0x4a9   :  { %v1850_v26 = vsel %vm1839_vm15, %v1826_v61, 0 }
 0x4aa   :  { %v1782_v25 = vpop.f32.mrf.mxu0 }
 0x4ab   :  { %v1783_v18 = vadd.f32 %v2305_v52, %v1782_v25 }
 0x4ad   :  { %v1813_v7 = vmax.f32 %v1783_v18, 0.0 }
 0x4b2   :  { %v1784_v30 = vpop.f32.mrf.mxu0 }
 0x4b3   :  { %v1785_v63 = vadd.f32 %v2305_v52, %v1784_v30 }
 0x4b5   :  { %v1814_v28 = vmax.f32 %v1785_v63, 0.0 }
 0x4b7   :  { %v1827_v0 = vpack.c.bf16 %v1814_v28, %v1813_v7 }
 0x4b9   :  { %v1853_v34 = vsel %vm1839_vm15, %v1827_v0, 0 }
 0x4ba   :  { %v1787_v15 = vpop.f32.mrf.mxu0 }
 0x4bb   :  { %v1788_v32 = vadd.f32 %v2305_v52, %v1787_v15 }
 0x4bd   :  { %v1815_v1 = vmax.f32 %v1788_v32, 0.0 }
 0x4c2   :  { %v1789_v38 = vpop.f32.mrf.mxu0 }
 0x4c3   :  { %v1790_v36 = vadd.f32 %v2305_v52, %v1789_v38 }
 0x4c5   :  { %v1816_v2 = vmax.f32 %v1790_v36, 0.0 }
 0x4c7   :  { %v1828_v42 = vpack.c.bf16 %v1816_v2, %v1815_v1 }
 0x4c9   :  { %v1856_v31 = vsel %vm1839_vm15, %v1828_v42, 0 }
 0x4ca   :  { %v1792_v3 = vpop.f32.mrf.mxu0 }
 0x4cb   :  { %v1793_v10 = vadd.f32 %v2305_v52, %v1792_v3 }
 0x4cd   :  { %v1817_v22 = vmax.f32 %v1793_v10, 0.0 }
 0x4d2   :  { %v1794_v29 = vpop.f32.mrf.mxu0 }
 0x4d3   :  { %v1795_v37 = vadd.f32 %v2305_v52, %v1794_v29 }
 0x4d5   :  { %v1818_v21 = vmax.f32 %v1795_v37, 0.0 }
 0x4d7   :  { %v1829_v24 = vpack.c.bf16 %v1818_v21, %v1817_v22 }
 0x4d9   :  { %v1859_v27 = vsel %vm1839_vm15, %v1829_v24, 0 }
 0x4da   :  { %v1797_v40 = vpop.f32.mrf.mxu0 }
 0x4db   :  { %v1798_v17 = vadd.f32 %v2305_v52, %v1797_v40 }
 0x4dd   :  { %v1819_v47 = vmax.f32 %v1798_v17, 0.0 }
 0x4e2   :  { %v1799_v5 = vpop.f32.mrf.mxu0 }
 0x4e3   :  { %v1800_v13 = vadd.f32 %v2305_v52, %v1799_v5 }
 0x4e5   :  { %v1820_v8 = vmax.f32 %v1800_v13, 0.0 }
 0x4e7   :  { %v1830_v43 = vpack.c.bf16 %v1820_v8, %v1819_v47 }
 0x4e9   :  { %v1862_v23 = vsel %vm1839_vm15, %v1830_v43, 0 }
 0x4ea   :  { %v1802_v62 = vpop.f32.mrf.mxu0 }
 0x4eb   :  { %v1803_v6 = vadd.f32 %v2305_v52, %v1802_v62 }
 0x4ed   :  { %v1821_v11 = vmax.f32 %v1803_v6, 0.0 }
 0x4f2   :  { %v1804_v4 = vpop.f32.mrf.mxu0 }
 0x4f3   :  { %v1805_v12 = vadd.f32 %v2305_v52, %v1804_v4  ;;  %v1823_v52 = vld [vmem:[%s3234_s19] sm:$0x1] }
 0x4f5   :  { %v1822_v14 = vmax.f32 %v1805_v12, 0.0 }
 0x4f7   :  { %v1831_v20 = vpack.c.bf16 %v1822_v14, %v1821_v11 }
 0x4f9   :  { %v1865_v45 = vsel %vm1839_vm15, %v1831_v20, 0 }
 0x4fa   :  { %1867 = vmatpush.bf16.xpose.msrb.mxu1 %v1865_v45 }
 0x502   :  { %1868 = vmatpush.bf16.xpose.msrb.mxu1 %v1862_v23 }
 0x50a   :  { %1869 = vmatpush.bf16.xpose.msrb.mxu1 %v1859_v27 }
 0x512   :  { %1870 = vmatpush.bf16.xpose.msrb.mxu1 %v1856_v31 }
 0x51a   :  { %1871 = vmatpush.bf16.xpose.msrb.mxu1 %v1853_v34 }
 0x522   :  { %1872 = vmatpush.bf16.xpose.msrb.mxu1 %v1850_v26 }
 0x52a   :  { %1873 = vmatpush.bf16.xpose.msrb.mxu1 %v1847_v35 }
 0x532   :  { %1874 = vmatpush.bf16.xpose.msrb.mxu1 %v1844_v55 }
 0x539   :  { %2225 = vmatmul.msk.bf16.vlgmr.msrb.gmra.mxu1 %vm1839_vm15, %v1823_v52 }
 0x5b6   :  { %v1876_v16 = vpop.f32.mrf.mxu1 }
 0x5b7   :  { %v1877_v41 = vadd.f32 %v1876_v16, %v1838_v39 }
 0x5b9   :  { %1880 = vst [vmem:[%s3235_s21] sm:$0x1] %v1877_v41 }
 0x5be   :  { %v1878_v9 = vpop.f32.mrf.mxu1 }

</bundles_post_ra>
